<compile_context>
chip_gen: v7x
topology: tpu7x:2x2x1
jax: 0.10.0
libtpu: 0.0.40
codegen_flags: <defaults>
</compile_context>

<pallas_src>
import math

import jax
import jax.numpy as jnp
from jax import lax
from jax.experimental import pallas as pl
from jax.experimental.pallas import tpu as pltpu

# ----------------------------- model config ---------------------------------
VOCAB = 100
HIDDEN = 32
NUM_HEADS = 4
HEAD_DIM = HIDDEN // NUM_HEADS
FFN = 64
NUM_LAYERS = 2
MAX_POS = 16
SEQ = 8
BATCH = 2
TOKENS = BATCH * SEQ                 # all sequences folded into one [T, H] slab
HT = NUM_HEADS * TOKENS              # heads folded into the row axis: 64 rows
LN_EPS = 1e-12

# rows of the packed per-layer vector slab `vecs` [L, 6, H]
_BO, _LN1G, _LN1B, _B2, _LN2G, _LN2B = range(6)
# rows of the packed global vector slab `gvec` [3, H]
_EMBG, _EMBB, _POOLB = range(3)


def _gelu_tanh(x):
    return 0.5 * x * (1.0 + jnp.tanh(0.7978845608028654 * (x + 0.044715 * x * x * x)))


def _layernorm(y, gamma, beta):
    mu = jnp.mean(y, axis=-1, keepdims=True)
    var = jnp.mean((y - mu) ** 2, axis=-1, keepdims=True)
    return (y - mu) * lax.rsqrt(var + LN_EPS) * gamma + beta


def _softmax_lastdim(s):
    s_max = jnp.max(s, axis=-1, keepdims=True)
    e = jnp.exp(s - s_max)
    # divide -> EUP reciprocal slot (VALU stays free)
    return e * pl.reciprocal(jnp.sum(e, axis=-1, keepdims=True), approx=True)


# ------------------------------ fused kernel ---------------------------------
def encoder_kernel(x_ref, mask_ref, wqkv_ref, bqkv_ref, wo_ref,
                   w1_ref, b1_ref, w2_ref, vecs_ref, gvec_ref, wp_ref, o_ref):
    scale = 1.0 / math.sqrt(HEAD_DIM)
    mask_add = mask_ref[...]                       # [HT, HT]: heads+batch+padding

    # --- prologue: embedding LayerNorm (fused) ---
    x = _layernorm(x_ref[...], gvec_ref[_EMBG:_EMBG + 1, :],
                   gvec_ref[_EMBB:_EMBB + 1, :])                       # [T, H]

    # --- statically unrolled layers; x never leaves VMEM ---
    for l in range(NUM_LAYERS):
        v = vecs_ref[l]                            # [6, H] packed per-layer vectors

        # Q/K/V: per-head weights [NH, H, HD] -> NH-batched matmuls (no lane
        # slicing / stacking), then fold heads into the row axis (free
        # leading-dim reshape).  Biases are pre-folded host-side to [HT, HD].
        xb = jnp.broadcast_to(x, (NUM_HEADS, TOKENS, HIDDEN))

        def proj(i, l=l, xb=xb):
            p3 = lax.dot_general(xb, wqkv_ref[l * 3 + i],
                                 dimension_numbers=(((2,), (1,)), ((0,), (0,))),
                                 preferred_element_type=jnp.float32)  # [NH,T,HD]
            return p3.reshape(HT, HEAD_DIM) + bqkv_ref[l * 3 + i]     # [HT, HD]

        q_f, k_f, v_f = proj(0), proj(1), proj(2)

        # Attention: TWO full [HT, *] matmuls instead of NH tiny per-head ones.
        # Mask is block-diagonal over heads AND batches, so one row-softmax
        # over HT keys equals the per-head/per-batch softmax.
        s = lax.dot_general(q_f, k_f, dimension_numbers=(((1,), (1,)), ((), ())),
                            preferred_element_type=jnp.float32) * scale  # [HT,HT]
        p = _softmax_lastdim(s + mask_add)
        ctx = jnp.dot(p, v_f, preferred_element_type=jnp.float32)        # [HT,HD]

        # Output projection: per-head weights [NH, HD, H]; reduce over the
        # major head axis (no lane-dim concatenate).
        ctx3 = ctx.reshape(NUM_HEADS, TOKENS, HEAD_DIM)
        attn = lax.dot_general(ctx3, wo_ref[l],
                               dimension_numbers=(((2,), (1,)), ((0,), (0,))),
                               preferred_element_type=jnp.float32)       # [NH,T,H]
        attn = jnp.sum(attn, axis=0) + v[_BO:_BO + 1, :]                  # [T, H]
        x = _layernorm(x + attn, v[_LN1G:_LN1G + 1, :], v[_LN1B:_LN1B + 1, :])

        # --- FFN ---
        h_mid = _gelu_tanh(jnp.dot(x, w1_ref[l],
                                   preferred_element_type=jnp.float32) + b1_ref[l])
        y = jnp.dot(h_mid, w2_ref[l],
                    preferred_element_type=jnp.float32) + v[_B2:_B2 + 1, :]
        x = _layernorm(x + y, v[_LN2G:_LN2G + 1, :], v[_LN2B:_LN2B + 1, :])

    # --- epilogue: pooler tanh(Linear(CLS)).  CLS rows gathered with a 0/1
    # selection matmul built from iota (MXU path, no sublane shuffles, no DMA).
    rows = lax.broadcasted_iota(jnp.int32, (BATCH, TOKENS), 0)
    cols = lax.broadcasted_iota(jnp.int32, (BATCH, TOKENS), 1)
    sel = (cols == rows * SEQ).astype(jnp.float32)                        # [B, T]
    cls = jnp.dot(sel, x, preferred_element_type=jnp.float32)             # [B, H]
    o_ref[...] = jnp.tanh(
        jnp.dot(cls, wp_ref[...], preferred_element_type=jnp.float32)
        + gvec_ref[_POOLB:_POOLB + 1, :])


# --------------------------- pallas_call wrapper ------------------------------
def _full_spec(shape):
    return pl.BlockSpec(shape, lambda i: tuple(0 for _ in shape))


def encoder_call(x_emb, mask_add, p):
    inputs = (x_emb, mask_add,
              p["wqkv_h"], p["bqkv_f"], p["wo_h"],
              p["w1"], p["b1"], p["w2"],
              p["vecs"], p["gvec"], p["pool_w"])
    return pl.pallas_call(
        encoder_kernel,
        out_shape=jax.ShapeDtypeStruct((BATCH, HIDDEN), jnp.float32),
        grid=(1,),
        in_specs=[_full_spec(a.shape) for a in inputs],
        out_specs=_full_spec((BATCH, HIDDEN)),
        compiler_params=pltpu.CompilerParams(
            dimension_semantics=("arbitrary",),
            vmem_limit_bytes=32 * 1024 * 1024),
    )(*inputs)


# ----------------------------- parameter init --------------------------------
def init_params(key):
    def norm(k, shape, scale=0.02):
        return scale * jax.random.normal(k, shape, dtype=jnp.float32)

    keys = iter(jax.random.split(key, 4 + NUM_LAYERS * 6))
    params = {
        "word_emb": norm(next(keys), (VOCAB, HIDDEN)),
        "pos_emb": norm(next(keys), (MAX_POS, HIDDEN)),
        "type_emb": norm(next(keys), (2, HIDDEN)),
        "pool_w": norm(next(keys), (HIDDEN, HIDDEN)),
    }
    # Global packed vectors [3, H]: emb_ln_g, emb_ln_b, pool_b.
    params["gvec"] = jnp.stack([jnp.ones((HIDDEN,), jnp.float32),
                                jnp.zeros((HIDDEN,), jnp.float32),
                                jnp.zeros((HIDDEN,), jnp.float32)], axis=0)

    wqkv, wo_h, w1, w2 = [], [], [], []
    for _ in range(NUM_LAYERS):
        wq = norm(next(keys), (HIDDEN, HIDDEN))
        wk = norm(next(keys), (HIDDEN, HIDDEN))
        wv = norm(next(keys), (HIDDEN, HIDDEN))
        wo = norm(next(keys), (HIDDEN, HIDDEN))
        w1.append(norm(next(keys), (HIDDEN, FFN)))
        w2.append(norm(next(keys), (FFN, HIDDEN)))
        # Per-head pre-split layouts (one-time host prep, no in-kernel slicing):
        #   Q/K/V:  [NH, H, HD]   (columns of W grouped per head)
        #   Wo:     [NH, HD, H]   (rows of Wo grouped per head)
        for w in (wq, wk, wv):
            wqkv.append(w.reshape(HIDDEN, NUM_HEADS, HEAD_DIM).transpose(1, 0, 2))
        wo_h.append(wo.reshape(NUM_HEADS, HEAD_DIM, HIDDEN))

    params["wqkv_h"] = jnp.stack(wqkv)                        # [L*3, NH, H, HD]
    # Q/K/V biases (zero-init) pre-folded to the head-in-rows layout [HT, HD].
    bqkv = jnp.zeros((NUM_LAYERS * 3, NUM_HEADS, 1, HEAD_DIM), jnp.float32)
    params["bqkv_f"] = jnp.broadcast_to(
        bqkv, (NUM_LAYERS * 3, NUM_HEADS, TOKENS, HEAD_DIM)
    ).reshape(NUM_LAYERS * 3, HT, HEAD_DIM)                   # [L*3, HT, HD]
    params["wo_h"] = jnp.stack(wo_h)                          # [L, NH, HD, H]
    params["w1"] = jnp.stack(w1)                              # [L, H, FFN]
    params["b1"] = jnp.zeros((NUM_LAYERS, 1, FFN), jnp.float32)
    params["w2"] = jnp.stack(w2)                              # [L, FFN, H]
    # Packed per-layer 1-row vectors [L, 6, H] (rows: bo, ln1_g, ln1_b, b2,
    # ln2_g, ln2_b) -> one DMA instead of six.
    ones_h = jnp.ones((HIDDEN,), jnp.float32)
    zeros_h = jnp.zeros((HIDDEN,), jnp.float32)
    layer_vec = jnp.stack([zeros_h, ones_h, zeros_h, zeros_h, ones_h, zeros_h])
    params["vecs"] = jnp.tile(layer_vec[None], (NUM_LAYERS, 1, 1))
    return params


# ------------------------------ forward (glue + kernel) ----------------------
def _build_additive_mask(attention_mask):
    """[NH*T, NH*T] additive mask, block-diagonal over heads AND batches,
    with padded key positions masked out (0 keep / -1e9 drop)."""
    am = attention_mask.astype(jnp.float32).reshape(-1)                   # [T]
    batch_id = jnp.repeat(jnp.arange(BATCH), SEQ)                         # [T]
    same_batch = (batch_id[:, None] == batch_id[None, :]).astype(jnp.float32)
    keep_tt = same_batch * am[None, :]                                    # [T, T]
    head_eye = jnp.eye(NUM_HEADS, dtype=jnp.float32)
    keep = head_eye[:, None, :, None] * keep_tt[None, :, None, :]         # [NH,T,NH,T]
    return (keep.reshape(HT, HT) - 1.0) * 1e9


@jax.jit
def kf_text_encoder_forward(token_ids, attention_mask, params):
    """Equivalent of KFTextEncoder.forward on pre-tokenized input.
    Returns pooler_output [B, HIDDEN]."""
    B, S = token_ids.shape
    # Embedding lookup (glue gather stays in XLA): word + position + type(0).
    x = (jnp.take(params["word_emb"], token_ids.reshape(-1), axis=0)
         + jnp.tile(params["pos_emb"][:S], (B, 1))
         + params["type_emb"][0][None, :])                                # [T, H]
    mask_add = _build_additive_mask(attention_mask)                       # [HT, HT]
    return encoder_call(x, mask_add, params)


# ---------------------------------- main --------------------------------------
if __name__ == "__main__":
    key = jax.random.PRNGKey(0)
    pkey, tkey = jax.random.split(key)
    params = init_params(pkey)

    # Deterministic "tokenized" batch: [CLS]=1 ... [SEP]=2, with padding=0.
    token_ids = jax.random.randint(tkey, (BATCH, SEQ), minval=3, maxval=VOCAB,
                                   dtype=jnp.int32)
    token_ids = token_ids.at[:, 0].set(1)
    token_ids = token_ids.at[0, SEQ - 1].set(2)
    token_ids = token_ids.at[1, SEQ - 3].set(2)
    token_ids = token_ids.at[1, SEQ - 2:].set(0)       # padded positions
    attention_mask = (token_ids != 0).astype(jnp.int32)

    out = kf_text_encoder_forward(token_ids, attention_mask, params)
    out = jax.block_until_ready(out)
    assert out.shape == (BATCH, HIDDEN) and out.dtype == jnp.float32
    assert bool(jnp.all(jnp.isfinite(out)))
    print("KERNEL_OK")
</pallas_src>

<mosaic_0001>
module attributes {stable_mosaic.version = 11 : i64} {
  func.func @encoder_kernel(%arg0: i32, %arg1: memref<16x32xf32, #tpu.memory_space<vmem>>, %arg2: memref<64x64xf32, #tpu.memory_space<vmem>>, %arg3: memref<6x4x32x8xf32, #tpu.memory_space<vmem>>, %arg4: memref<6x64x8xf32, #tpu.memory_space<vmem>>, %arg5: memref<2x4x8x32xf32, #tpu.memory_space<vmem>>, %arg6: memref<2x32x64xf32, #tpu.memory_space<vmem>>, %arg7: memref<2x1x64xf32, #tpu.memory_space<vmem>>, %arg8: memref<2x64x32xf32, #tpu.memory_space<vmem>>, %arg9: memref<2x6x32xf32, #tpu.memory_space<vmem>>, %arg10: memref<3x32xf32, #tpu.memory_space<vmem>>, %arg11: memref<32x32xf32, #tpu.memory_space<vmem>>, %arg12: memref<2x32xf32, #tpu.memory_space<vmem>>) attributes {dimension_semantics = [#tpu.dimension_semantics<arbitrary>], iteration_bounds = array<i64: 1>, scalar_prefetch = 0 : i64, scratch_operands = 0 : i64, tpu.core_type = #tpu.core_type<tc>, window_params = [{pipeline_mode = #tpu.pipeline_mode<synchronous>, transform_indices = @transform_0, window_bounds = array<i64: 16, 32>}, {pipeline_mode = #tpu.pipeline_mode<synchronous>, transform_indices = @transform_1, window_bounds = array<i64: 64, 64>}, {pipeline_mode = #tpu.pipeline_mode<synchronous>, transform_indices = @transform_2, window_bounds = array<i64: 6, 4, 32, 8>}, {pipeline_mode = #tpu.pipeline_mode<synchronous>, transform_indices = @transform_3, window_bounds = array<i64: 6, 64, 8>}, {pipeline_mode = #tpu.pipeline_mode<synchronous>, transform_indices = @transform_4, window_bounds = array<i64: 2, 4, 8, 32>}, {pipeline_mode = #tpu.pipeline_mode<synchronous>, transform_indices = @transform_5, window_bounds = array<i64: 2, 32, 64>}, {pipeline_mode = #tpu.pipeline_mode<synchronous>, transform_indices = @transform_6, window_bounds = array<i64: 2, 1, 64>}, {pipeline_mode = #tpu.pipeline_mode<synchronous>, transform_indices = @transform_7, window_bounds = array<i64: 2, 64, 32>}, {pipeline_mode = #tpu.pipeline_mode<synchronous>, transform_indices = @transform_8, window_bounds = array<i64: 2, 6, 32>}, {pipeline_mode = #tpu.pipeline_mode<synchronous>, transform_indices = @transform_9, window_bounds = array<i64: 3, 32>}, {pipeline_mode = #tpu.pipeline_mode<synchronous>, transform_indices = @transform_10, window_bounds = array<i64: 32, 32>}, {pipeline_mode = #tpu.pipeline_mode<synchronous>, transform_indices = @transform_11, window_bounds = array<i64: 2, 32>}]} {
    %c0 = arith.constant 0 : index
    %c0_0 = arith.constant 0 : index
    %0 = vector.load %arg2[%c0, %c0_0] : memref<64x64xf32, #tpu.memory_space<vmem>>, vector<64x64xf32>
    %c0_1 = arith.constant 0 : index
    %c0_2 = arith.constant 0 : index
    %1 = vector.load %arg1[%c0_1, %c0_2] : memref<16x32xf32, #tpu.memory_space<vmem>>, vector<16x32xf32>
    %c0_3 = arith.constant 0 : index
    %c0_4 = arith.constant 0 : index
    %2 = vector.load %arg10[%c0_3, %c0_4] : memref<3x32xf32, #tpu.memory_space<vmem>>, vector<1x32xf32>
    %c1 = arith.constant 1 : index
    %c0_5 = arith.constant 0 : index
    %3 = vector.load %arg10[%c1, %c0_5] : memref<3x32xf32, #tpu.memory_space<vmem>>, vector<1x32xf32>
    %cst = arith.constant dense<0.000000e+00> : vector<16xf32>
    %4 = vector.multi_reduction <add>, %1, %cst [1] : vector<16x32xf32> to vector<16xf32>
    %5 = vector.shape_cast %4 : vector<16xf32> to vector<16x1xf32>
    %cst_6 = arith.constant 3.200000e+01 : f32
    %6 = vector.broadcast %cst_6 : f32 to vector<16x1xf32>
    %7 = arith.divf %5, %6 : vector<16x1xf32>
    %8 = vector.broadcast %7 : vector<16x1xf32> to vector<16x32xf32>
    %9 = arith.subf %1, %8 : vector<16x32xf32>
    %10 = arith.mulf %9, %9 : vector<16x32xf32>
    %cst_7 = arith.constant dense<0.000000e+00> : vector<16xf32>
    %11 = vector.multi_reduction <add>, %10, %cst_7 [1] : vector<16x32xf32> to vector<16xf32>
    %12 = vector.shape_cast %11 : vector<16xf32> to vector<16x1xf32>
    %cst_8 = arith.constant 3.200000e+01 : f32
    %13 = vector.broadcast %cst_8 : f32 to vector<16x1xf32>
    %14 = arith.divf %12, %13 : vector<16x1xf32>
    %15 = vector.broadcast %7 : vector<16x1xf32> to vector<16x32xf32>
    %16 = arith.subf %1, %15 : vector<16x32xf32>
    %cst_9 = arith.constant 9.99999996E-13 : f32
    %17 = vector.broadcast %cst_9 : f32 to vector<16x1xf32>
    %18 = arith.addf %14, %17 : vector<16x1xf32>
    %19 = math.rsqrt %18 : vector<16x1xf32>
    %20 = vector.broadcast %19 : vector<16x1xf32> to vector<16x32xf32>
    %21 = arith.mulf %16, %20 : vector<16x32xf32>
    %22 = vector.broadcast %2 : vector<1x32xf32> to vector<16x32xf32>
    %23 = arith.mulf %21, %22 : vector<16x32xf32>
    %24 = vector.broadcast %3 : vector<1x32xf32> to vector<16x32xf32>
    %25 = arith.addf %23, %24 : vector<16x32xf32>
    %c0_10 = arith.constant 0 : index
    %c0_11 = arith.constant 0 : index
    %c0_12 = arith.constant 0 : index
    %26 = vector.load %arg9[%c0_10, %c0_11, %c0_12] : memref<2x6x32xf32, #tpu.memory_space<vmem>>, vector<1x6x32xf32>
    %27 = vector.shape_cast %26 : vector<1x6x32xf32> to vector<6x32xf32>
    %28 = vector.shape_cast %25 : vector<16x32xf32> to vector<1x16x32xf32>
    %29 = vector.broadcast %28 : vector<1x16x32xf32> to vector<4x16x32xf32>
    %c0_13 = arith.constant 0 : index
    %c0_14 = arith.constant 0 : index
    %c0_15 = arith.constant 0 : index
    %c0_16 = arith.constant 0 : index
    %30 = vector.load %arg3[%c0_13, %c0_14, %c0_15, %c0_16] : memref<6x4x32x8xf32, #tpu.memory_space<vmem>>, vector<1x4x32x8xf32>
    %31 = vector.shape_cast %30 : vector<1x4x32x8xf32> to vector<4x32x8xf32>
    %cst_17 = arith.constant dense<0.000000e+00> : vector<4x16x8xf32>
    %32 = tpu.matmul %29, %31, %cst_17 {dimension_numbers = #tpu.dot_dimension_numbers<[2], [1], [1], [2], [0, 0, 0, 1, 1, 2], [0], [0]>} : vector<4x16x32xf32>, vector<4x32x8xf32>, vector<4x16x8xf32> -> vector<4x16x8xf32>
    %33 = vector.shape_cast %32 : vector<4x16x8xf32> to vector<64x8xf32>
    %c0_18 = arith.constant 0 : index
    %c0_19 = arith.constant 0 : index
    %c0_20 = arith.constant 0 : index
    %34 = vector.load %arg4[%c0_18, %c0_19, %c0_20] : memref<6x64x8xf32, #tpu.memory_space<vmem>>, vector<1x64x8xf32>
    %35 = vector.shape_cast %34 : vector<1x64x8xf32> to vector<64x8xf32>
    %36 = arith.addf %33, %35 : vector<64x8xf32>
    %c1_21 = arith.constant 1 : index
    %c0_22 = arith.constant 0 : index
    %c0_23 = arith.constant 0 : index
    %c0_24 = arith.constant 0 : index
    %37 = vector.load %arg3[%c1_21, %c0_22, %c0_23, %c0_24] : memref<6x4x32x8xf32, #tpu.memory_space<vmem>>, vector<1x4x32x8xf32>
    %38 = vector.shape_cast %37 : vector<1x4x32x8xf32> to vector<4x32x8xf32>
    %cst_25 = arith.constant dense<0.000000e+00> : vector<4x16x8xf32>
    %39 = tpu.matmul %29, %38, %cst_25 {dimension_numbers = #tpu.dot_dimension_numbers<[2], [1], [1], [2], [0, 0, 0, 1, 1, 2], [0], [0]>} : vector<4x16x32xf32>, vector<4x32x8xf32>, vector<4x16x8xf32> -> vector<4x16x8xf32>
    %40 = vector.shape_cast %39 : vector<4x16x8xf32> to vector<64x8xf32>
    %c1_26 = arith.constant 1 : index
    %c0_27 = arith.constant 0 : index
    %c0_28 = arith.constant 0 : index
    %41 = vector.load %arg4[%c1_26, %c0_27, %c0_28] : memref<6x64x8xf32, #tpu.memory_space<vmem>>, vector<1x64x8xf32>
    %42 = vector.shape_cast %41 : vector<1x64x8xf32> to vector<64x8xf32>
    %43 = arith.addf %40, %42 : vector<64x8xf32>
    %c2 = arith.constant 2 : index
    %c0_29 = arith.constant 0 : index
    %c0_30 = arith.constant 0 : index
    %c0_31 = arith.constant 0 : index
    %44 = vector.load %arg3[%c2, %c0_29, %c0_30, %c0_31] : memref<6x4x32x8xf32, #tpu.memory_space<vmem>>, vector<1x4x32x8xf32>
    %45 = vector.shape_cast %44 : vector<1x4x32x8xf32> to vector<4x32x8xf32>
    %cst_32 = arith.constant dense<0.000000e+00> : vector<4x16x8xf32>
    %46 = tpu.matmul %29, %45, %cst_32 {dimension_numbers = #tpu.dot_dimension_numbers<[2], [1], [1], [2], [0, 0, 0, 1, 1, 2], [0], [0]>} : vector<4x16x32xf32>, vector<4x32x8xf32>, vector<4x16x8xf32> -> vector<4x16x8xf32>
    %47 = vector.shape_cast %46 : vector<4x16x8xf32> to vector<64x8xf32>
    %c2_33 = arith.constant 2 : index
    %c0_34 = arith.constant 0 : index
    %c0_35 = arith.constant 0 : index
    %48 = vector.load %arg4[%c2_33, %c0_34, %c0_35] : memref<6x64x8xf32, #tpu.memory_space<vmem>>, vector<1x64x8xf32>
    %49 = vector.shape_cast %48 : vector<1x64x8xf32> to vector<64x8xf32>
    %50 = arith.addf %47, %49 : vector<64x8xf32>
    %cst_36 = arith.constant dense<0.000000e+00> : vector<64x64xf32>
    %51 = tpu.matmul %36, %43, %cst_36 {dimension_numbers = #tpu.dot_dimension_numbers<[1], [1], [0], [0], [0, 0, 1, 0], [], []>} : vector<64x8xf32>, vector<64x8xf32>, vector<64x64xf32> -> vector<64x64xf32>
    %cst_37 = arith.constant 0.353553385 : f32
    %52 = vector.broadcast %cst_37 : f32 to vector<64x64xf32>
    %53 = arith.mulf %51, %52 : vector<64x64xf32>
    %54 = arith.addf %53, %0 : vector<64x64xf32>
    %cst_38 = arith.constant dense<0xFF800000> : vector<64xf32>
    %55 = vector.multi_reduction <maximumf>, %54, %cst_38 [1] : vector<64x64xf32> to vector<64xf32>
    %56 = vector.shape_cast %55 : vector<64xf32> to vector<64x1xf32>
    %57 = vector.broadcast %56 : vector<64x1xf32> to vector<64x64xf32>
    %58 = arith.subf %54, %57 : vector<64x64xf32>
    %59 = math.exp %58 : vector<64x64xf32>
    %cst_39 = arith.constant dense<0.000000e+00> : vector<64xf32>
    %60 = vector.multi_reduction <add>, %59, %cst_39 [1] : vector<64x64xf32> to vector<64xf32>
    %61 = vector.shape_cast %60 : vector<64xf32> to vector<64x1xf32>
    %62 = tpu.reciprocal %61 {approx = true} : vector<64x1xf32> -> vector<64x1xf32>
    %63 = vector.broadcast %62 : vector<64x1xf32> to vector<64x64xf32>
    %64 = arith.mulf %59, %63 : vector<64x64xf32>
    %cst_40 = arith.constant dense<0.000000e+00> : vector<64x8xf32>
    %65 = tpu.matmul %64, %50, %cst_40 {dimension_numbers = #tpu.dot_dimension_numbers<[1], [0], [0], [1], [0, 0, 1, 1], [], []>} : vector<64x64xf32>, vector<64x8xf32>, vector<64x8xf32> -> vector<64x8xf32>
    %66 = vector.shape_cast %65 : vector<64x8xf32> to vector<4x16x8xf32>
    %c0_41 = arith.constant 0 : index
    %c0_42 = arith.constant 0 : index
    %c0_43 = arith.constant 0 : index
    %c0_44 = arith.constant 0 : index
    %67 = vector.load %arg5[%c0_41, %c0_42, %c0_43, %c0_44] : memref<2x4x8x32xf32, #tpu.memory_space<vmem>>, vector<1x4x8x32xf32>
    %68 = vector.shape_cast %67 : vector<1x4x8x32xf32> to vector<4x8x32xf32>
    %cst_45 = arith.constant dense<0.000000e+00> : vector<4x16x32xf32>
    %69 = tpu.matmul %66, %68, %cst_45 {dimension_numbers = #tpu.dot_dimension_numbers<[2], [1], [1], [2], [0, 0, 0, 1, 1, 2], [0], [0]>} : vector<4x16x8xf32>, vector<4x8x32xf32>, vector<4x16x32xf32> -> vector<4x16x32xf32>
    %cst_46 = arith.constant dense<0.000000e+00> : vector<16x32xf32>
    %70 = vector.multi_reduction <add>, %69, %cst_46 [0] : vector<4x16x32xf32> to vector<16x32xf32>
    %71 = vector.extract_strided_slice %27 {offsets = [0, 0], sizes = [1, 32], strides = [1, 1]} : vector<6x32xf32> to vector<1x32xf32>
    %72 = vector.broadcast %71 : vector<1x32xf32> to vector<16x32xf32>
    %73 = arith.addf %70, %72 : vector<16x32xf32>
    %74 = arith.addf %25, %73 : vector<16x32xf32>
    %75 = vector.extract_strided_slice %27 {offsets = [1, 0], sizes = [1, 32], strides = [1, 1]} : vector<6x32xf32> to vector<1x32xf32>
    %76 = vector.extract_strided_slice %27 {offsets = [2, 0], sizes = [1, 32], strides = [1, 1]} : vector<6x32xf32> to vector<1x32xf32>
    %cst_47 = arith.constant dense<0.000000e+00> : vector<16xf32>
    %77 = vector.multi_reduction <add>, %74, %cst_47 [1] : vector<16x32xf32> to vector<16xf32>
    %78 = vector.shape_cast %77 : vector<16xf32> to vector<16x1xf32>
    %cst_48 = arith.constant 3.200000e+01 : f32
    %79 = vector.broadcast %cst_48 : f32 to vector<16x1xf32>
    %80 = arith.divf %78, %79 : vector<16x1xf32>
    %81 = vector.broadcast %80 : vector<16x1xf32> to vector<16x32xf32>
    %82 = arith.subf %74, %81 : vector<16x32xf32>
    %83 = arith.mulf %82, %82 : vector<16x32xf32>
    %cst_49 = arith.constant dense<0.000000e+00> : vector<16xf32>
    %84 = vector.multi_reduction <add>, %83, %cst_49 [1] : vector<16x32xf32> to vector<16xf32>
    %85 = vector.shape_cast %84 : vector<16xf32> to vector<16x1xf32>
    %cst_50 = arith.constant 3.200000e+01 : f32
    %86 = vector.broadcast %cst_50 : f32 to vector<16x1xf32>
    %87 = arith.divf %85, %86 : vector<16x1xf32>
    %88 = vector.broadcast %80 : vector<16x1xf32> to vector<16x32xf32>
    %89 = arith.subf %74, %88 : vector<16x32xf32>
    %cst_51 = arith.constant 9.99999996E-13 : f32
    %90 = vector.broadcast %cst_51 : f32 to vector<16x1xf32>
    %91 = arith.addf %87, %90 : vector<16x1xf32>
    %92 = math.rsqrt %91 : vector<16x1xf32>
    %93 = vector.broadcast %92 : vector<16x1xf32> to vector<16x32xf32>
    %94 = arith.mulf %89, %93 : vector<16x32xf32>
    %95 = vector.broadcast %75 : vector<1x32xf32> to vector<16x32xf32>
    %96 = arith.mulf %94, %95 : vector<16x32xf32>
    %97 = vector.broadcast %76 : vector<1x32xf32> to vector<16x32xf32>
    %98 = arith.addf %96, %97 : vector<16x32xf32>
    %c0_52 = arith.constant 0 : index
    %c0_53 = arith.constant 0 : index
    %c0_54 = arith.constant 0 : index
    %99 = vector.load %arg6[%c0_52, %c0_53, %c0_54] : memref<2x32x64xf32, #tpu.memory_space<vmem>>, vector<1x32x64xf32>
    %100 = vector.shape_cast %99 : vector<1x32x64xf32> to vector<32x64xf32>
    %cst_55 = arith.constant dense<0.000000e+00> : vector<16x64xf32>
    %101 = tpu.matmul %98, %100, %cst_55 {dimension_numbers = #tpu.dot_dimension_numbers<[1], [0], [0], [1], [0, 0, 1, 1], [], []>} : vector<16x32xf32>, vector<32x64xf32>, vector<16x64xf32> -> vector<16x64xf32>
    %c0_56 = arith.constant 0 : index
    %c0_57 = arith.constant 0 : index
    %c0_58 = arith.constant 0 : index
    %102 = vector.load %arg7[%c0_56, %c0_57, %c0_58] : memref<2x1x64xf32, #tpu.memory_space<vmem>>, vector<1x1x64xf32>
    %103 = vector.shape_cast %102 : vector<1x1x64xf32> to vector<1x64xf32>
    %104 = vector.broadcast %103 : vector<1x64xf32> to vector<16x64xf32>
    %105 = arith.addf %101, %104 : vector<16x64xf32>
    %cst_59 = arith.constant 5.000000e-01 : f32
    %106 = vector.broadcast %cst_59 : f32 to vector<16x64xf32>
    %107 = arith.mulf %106, %105 : vector<16x64xf32>
    %cst_60 = arith.constant 4.471500e-02 : f32
    %108 = vector.broadcast %cst_60 : f32 to vector<16x64xf32>
    %109 = arith.mulf %108, %105 : vector<16x64xf32>
    %110 = arith.mulf %109, %105 : vector<16x64xf32>
    %111 = arith.mulf %110, %105 : vector<16x64xf32>
    %112 = arith.addf %105, %111 : vector<16x64xf32>
    %cst_61 = arith.constant 0.797884583 : f32
    %113 = vector.broadcast %cst_61 : f32 to vector<16x64xf32>
    %114 = arith.mulf %113, %112 : vector<16x64xf32>
    %115 = math.tanh %114 : vector<16x64xf32>
    %cst_62 = arith.constant 1.000000e+00 : f32
    %116 = vector.broadcast %cst_62 : f32 to vector<16x64xf32>
    %117 = arith.addf %116, %115 : vector<16x64xf32>
    %118 = arith.mulf %107, %117 : vector<16x64xf32>
    %c0_63 = arith.constant 0 : index
    %c0_64 = arith.constant 0 : index
    %c0_65 = arith.constant 0 : index
    %119 = vector.load %arg8[%c0_63, %c0_64, %c0_65] : memref<2x64x32xf32, #tpu.memory_space<vmem>>, vector<1x64x32xf32>
    %120 = vector.shape_cast %119 : vector<1x64x32xf32> to vector<64x32xf32>
    %cst_66 = arith.constant dense<0.000000e+00> : vector<16x32xf32>
    %121 = tpu.matmul %118, %120, %cst_66 {dimension_numbers = #tpu.dot_dimension_numbers<[1], [0], [0], [1], [0, 0, 1, 1], [], []>} : vector<16x64xf32>, vector<64x32xf32>, vector<16x32xf32> -> vector<16x32xf32>
    %122 = vector.extract_strided_slice %27 {offsets = [3, 0], sizes = [1, 32], strides = [1, 1]} : vector<6x32xf32> to vector<1x32xf32>
    %123 = vector.broadcast %122 : vector<1x32xf32> to vector<16x32xf32>
    %124 = arith.addf %121, %123 : vector<16x32xf32>
    %125 = arith.addf %98, %124 : vector<16x32xf32>
    %126 = vector.extract_strided_slice %27 {offsets = [4, 0], sizes = [1, 32], strides = [1, 1]} : vector<6x32xf32> to vector<1x32xf32>
    %127 = vector.extract_strided_slice %27 {offsets = [5, 0], sizes = [1, 32], strides = [1, 1]} : vector<6x32xf32> to vector<1x32xf32>
    %cst_67 = arith.constant dense<0.000000e+00> : vector<16xf32>
    %128 = vector.multi_reduction <add>, %125, %cst_67 [1] : vector<16x32xf32> to vector<16xf32>
    %129 = vector.shape_cast %128 : vector<16xf32> to vector<16x1xf32>
    %cst_68 = arith.constant 3.200000e+01 : f32
    %130 = vector.broadcast %cst_68 : f32 to vector<16x1xf32>
    %131 = arith.divf %129, %130 : vector<16x1xf32>
    %132 = vector.broadcast %131 : vector<16x1xf32> to vector<16x32xf32>
    %133 = arith.subf %125, %132 : vector<16x32xf32>
    %134 = arith.mulf %133, %133 : vector<16x32xf32>
    %cst_69 = arith.constant dense<0.000000e+00> : vector<16xf32>
    %135 = vector.multi_reduction <add>, %134, %cst_69 [1] : vector<16x32xf32> to vector<16xf32>
    %136 = vector.shape_cast %135 : vector<16xf32> to vector<16x1xf32>
    %cst_70 = arith.constant 3.200000e+01 : f32
    %137 = vector.broadcast %cst_70 : f32 to vector<16x1xf32>
    %138 = arith.divf %136, %137 : vector<16x1xf32>
    %139 = vector.broadcast %131 : vector<16x1xf32> to vector<16x32xf32>
    %140 = arith.subf %125, %139 : vector<16x32xf32>
    %cst_71 = arith.constant 9.99999996E-13 : f32
    %141 = vector.broadcast %cst_71 : f32 to vector<16x1xf32>
    %142 = arith.addf %138, %141 : vector<16x1xf32>
    %143 = math.rsqrt %142 : vector<16x1xf32>
    %144 = vector.broadcast %143 : vector<16x1xf32> to vector<16x32xf32>
    %145 = arith.mulf %140, %144 : vector<16x32xf32>
    %146 = vector.broadcast %126 : vector<1x32xf32> to vector<16x32xf32>
    %147 = arith.mulf %145, %146 : vector<16x32xf32>
    %148 = vector.broadcast %127 : vector<1x32xf32> to vector<16x32xf32>
    %149 = arith.addf %147, %148 : vector<16x32xf32>
    %c1_72 = arith.constant 1 : index
    %c0_73 = arith.constant 0 : index
    %c0_74 = arith.constant 0 : index
    %150 = vector.load %arg9[%c1_72, %c0_73, %c0_74] : memref<2x6x32xf32, #tpu.memory_space<vmem>>, vector<1x6x32xf32>
    %151 = vector.shape_cast %150 : vector<1x6x32xf32> to vector<6x32xf32>
    %152 = vector.shape_cast %149 : vector<16x32xf32> to vector<1x16x32xf32>
    %153 = vector.broadcast %152 : vector<1x16x32xf32> to vector<4x16x32xf32>
    %c3 = arith.constant 3 : index
    %c0_75 = arith.constant 0 : index
    %c0_76 = arith.constant 0 : index
    %c0_77 = arith.constant 0 : index
    %154 = vector.load %arg3[%c3, %c0_75, %c0_76, %c0_77] : memref<6x4x32x8xf32, #tpu.memory_space<vmem>>, vector<1x4x32x8xf32>
    %155 = vector.shape_cast %154 : vector<1x4x32x8xf32> to vector<4x32x8xf32>
    %cst_78 = arith.constant dense<0.000000e+00> : vector<4x16x8xf32>
    %156 = tpu.matmul %153, %155, %cst_78 {dimension_numbers = #tpu.dot_dimension_numbers<[2], [1], [1], [2], [0, 0, 0, 1, 1, 2], [0], [0]>} : vector<4x16x32xf32>, vector<4x32x8xf32>, vector<4x16x8xf32> -> vector<4x16x8xf32>
    %157 = vector.shape_cast %156 : vector<4x16x8xf32> to vector<64x8xf32>
    %c3_79 = arith.constant 3 : index
    %c0_80 = arith.constant 0 : index
    %c0_81 = arith.constant 0 : index
    %158 = vector.load %arg4[%c3_79, %c0_80, %c0_81] : memref<6x64x8xf32, #tpu.memory_space<vmem>>, vector<1x64x8xf32>
    %159 = vector.shape_cast %158 : vector<1x64x8xf32> to vector<64x8xf32>
    %160 = arith.addf %157, %159 : vector<64x8xf32>
    %c4 = arith.constant 4 : index
    %c0_82 = arith.constant 0 : index
    %c0_83 = arith.constant 0 : index
    %c0_84 = arith.constant 0 : index
    %161 = vector.load %arg3[%c4, %c0_82, %c0_83, %c0_84] : memref<6x4x32x8xf32, #tpu.memory_space<vmem>>, vector<1x4x32x8xf32>
    %162 = vector.shape_cast %161 : vector<1x4x32x8xf32> to vector<4x32x8xf32>
    %cst_85 = arith.constant dense<0.000000e+00> : vector<4x16x8xf32>
    %163 = tpu.matmul %153, %162, %cst_85 {dimension_numbers = #tpu.dot_dimension_numbers<[2], [1], [1], [2], [0, 0, 0, 1, 1, 2], [0], [0]>} : vector<4x16x32xf32>, vector<4x32x8xf32>, vector<4x16x8xf32> -> vector<4x16x8xf32>
    %164 = vector.shape_cast %163 : vector<4x16x8xf32> to vector<64x8xf32>
    %c4_86 = arith.constant 4 : index
    %c0_87 = arith.constant 0 : index
    %c0_88 = arith.constant 0 : index
    %165 = vector.load %arg4[%c4_86, %c0_87, %c0_88] : memref<6x64x8xf32, #tpu.memory_space<vmem>>, vector<1x64x8xf32>
    %166 = vector.shape_cast %165 : vector<1x64x8xf32> to vector<64x8xf32>
    %167 = arith.addf %164, %166 : vector<64x8xf32>
    %c5 = arith.constant 5 : index
    %c0_89 = arith.constant 0 : index
    %c0_90 = arith.constant 0 : index
    %c0_91 = arith.constant 0 : index
    %168 = vector.load %arg3[%c5, %c0_89, %c0_90, %c0_91] : memref<6x4x32x8xf32, #tpu.memory_space<vmem>>, vector<1x4x32x8xf32>
    %169 = vector.shape_cast %168 : vector<1x4x32x8xf32> to vector<4x32x8xf32>
    %cst_92 = arith.constant dense<0.000000e+00> : vector<4x16x8xf32>
    %170 = tpu.matmul %153, %169, %cst_92 {dimension_numbers = #tpu.dot_dimension_numbers<[2], [1], [1], [2], [0, 0, 0, 1, 1, 2], [0], [0]>} : vector<4x16x32xf32>, vector<4x32x8xf32>, vector<4x16x8xf32> -> vector<4x16x8xf32>
    %171 = vector.shape_cast %170 : vector<4x16x8xf32> to vector<64x8xf32>
    %c5_93 = arith.constant 5 : index
    %c0_94 = arith.constant 0 : index
    %c0_95 = arith.constant 0 : index
    %172 = vector.load %arg4[%c5_93, %c0_94, %c0_95] : memref<6x64x8xf32, #tpu.memory_space<vmem>>, vector<1x64x8xf32>
    %173 = vector.shape_cast %172 : vector<1x64x8xf32> to vector<64x8xf32>
    %174 = arith.addf %171, %173 : vector<64x8xf32>
    %cst_96 = arith.constant dense<0.000000e+00> : vector<64x64xf32>
    %175 = tpu.matmul %160, %167, %cst_96 {dimension_numbers = #tpu.dot_dimension_numbers<[1], [1], [0], [0], [0, 0, 1, 0], [], []>} : vector<64x8xf32>, vector<64x8xf32>, vector<64x64xf32> -> vector<64x64xf32>
    %cst_97 = arith.constant 0.353553385 : f32
    %176 = vector.broadcast %cst_97 : f32 to vector<64x64xf32>
    %177 = arith.mulf %175, %176 : vector<64x64xf32>
    %178 = arith.addf %177, %0 : vector<64x64xf32>
    %cst_98 = arith.constant dense<0xFF800000> : vector<64xf32>
    %179 = vector.multi_reduction <maximumf>, %178, %cst_98 [1] : vector<64x64xf32> to vector<64xf32>
    %180 = vector.shape_cast %179 : vector<64xf32> to vector<64x1xf32>
    %181 = vector.broadcast %180 : vector<64x1xf32> to vector<64x64xf32>
    %182 = arith.subf %178, %181 : vector<64x64xf32>
    %183 = math.exp %182 : vector<64x64xf32>
    %cst_99 = arith.constant dense<0.000000e+00> : vector<64xf32>
    %184 = vector.multi_reduction <add>, %183, %cst_99 [1] : vector<64x64xf32> to vector<64xf32>
    %185 = vector.shape_cast %184 : vector<64xf32> to vector<64x1xf32>
    %186 = tpu.reciprocal %185 {approx = true} : vector<64x1xf32> -> vector<64x1xf32>
    %187 = vector.broadcast %186 : vector<64x1xf32> to vector<64x64xf32>
    %188 = arith.mulf %183, %187 : vector<64x64xf32>
    %cst_100 = arith.constant dense<0.000000e+00> : vector<64x8xf32>
    %189 = tpu.matmul %188, %174, %cst_100 {dimension_numbers = #tpu.dot_dimension_numbers<[1], [0], [0], [1], [0, 0, 1, 1], [], []>} : vector<64x64xf32>, vector<64x8xf32>, vector<64x8xf32> -> vector<64x8xf32>
    %190 = vector.shape_cast %189 : vector<64x8xf32> to vector<4x16x8xf32>
    %c1_101 = arith.constant 1 : index
    %c0_102 = arith.constant 0 : index
    %c0_103 = arith.constant 0 : index
    %c0_104 = arith.constant 0 : index
    %191 = vector.load %arg5[%c1_101, %c0_102, %c0_103, %c0_104] : memref<2x4x8x32xf32, #tpu.memory_space<vmem>>, vector<1x4x8x32xf32>
    %192 = vector.shape_cast %191 : vector<1x4x8x32xf32> to vector<4x8x32xf32>
    %cst_105 = arith.constant dense<0.000000e+00> : vector<4x16x32xf32>
    %193 = tpu.matmul %190, %192, %cst_105 {dimension_numbers = #tpu.dot_dimension_numbers<[2], [1], [1], [2], [0, 0, 0, 1, 1, 2], [0], [0]>} : vector<4x16x8xf32>, vector<4x8x32xf32>, vector<4x16x32xf32> -> vector<4x16x32xf32>
    %cst_106 = arith.constant dense<0.000000e+00> : vector<16x32xf32>
    %194 = vector.multi_reduction <add>, %193, %cst_106 [0] : vector<4x16x32xf32> to vector<16x32xf32>
    %195 = vector.extract_strided_slice %151 {offsets = [0, 0], sizes = [1, 32], strides = [1, 1]} : vector<6x32xf32> to vector<1x32xf32>
    %196 = vector.broadcast %195 : vector<1x32xf32> to vector<16x32xf32>
    %197 = arith.addf %194, %196 : vector<16x32xf32>
    %198 = arith.addf %149, %197 : vector<16x32xf32>
    %199 = vector.extract_strided_slice %151 {offsets = [1, 0], sizes = [1, 32], strides = [1, 1]} : vector<6x32xf32> to vector<1x32xf32>
    %200 = vector.extract_strided_slice %151 {offsets = [2, 0], sizes = [1, 32], strides = [1, 1]} : vector<6x32xf32> to vector<1x32xf32>
    %cst_107 = arith.constant dense<0.000000e+00> : vector<16xf32>
    %201 = vector.multi_reduction <add>, %198, %cst_107 [1] : vector<16x32xf32> to vector<16xf32>
    %202 = vector.shape_cast %201 : vector<16xf32> to vector<16x1xf32>
    %cst_108 = arith.constant 3.200000e+01 : f32
    %203 = vector.broadcast %cst_108 : f32 to vector<16x1xf32>
    %204 = arith.divf %202, %203 : vector<16x1xf32>
    %205 = vector.broadcast %204 : vector<16x1xf32> to vector<16x32xf32>
    %206 = arith.subf %198, %205 : vector<16x32xf32>
    %207 = arith.mulf %206, %206 : vector<16x32xf32>
    %cst_109 = arith.constant dense<0.000000e+00> : vector<16xf32>
    %208 = vector.multi_reduction <add>, %207, %cst_109 [1] : vector<16x32xf32> to vector<16xf32>
    %209 = vector.shape_cast %208 : vector<16xf32> to vector<16x1xf32>
    %cst_110 = arith.constant 3.200000e+01 : f32
    %210 = vector.broadcast %cst_110 : f32 to vector<16x1xf32>
    %211 = arith.divf %209, %210 : vector<16x1xf32>
    %212 = vector.broadcast %204 : vector<16x1xf32> to vector<16x32xf32>
    %213 = arith.subf %198, %212 : vector<16x32xf32>
    %cst_111 = arith.constant 9.99999996E-13 : f32
    %214 = vector.broadcast %cst_111 : f32 to vector<16x1xf32>
    %215 = arith.addf %211, %214 : vector<16x1xf32>
    %216 = math.rsqrt %215 : vector<16x1xf32>
    %217 = vector.broadcast %216 : vector<16x1xf32> to vector<16x32xf32>
    %218 = arith.mulf %213, %217 : vector<16x32xf32>
    %219 = vector.broadcast %199 : vector<1x32xf32> to vector<16x32xf32>
    %220 = arith.mulf %218, %219 : vector<16x32xf32>
    %221 = vector.broadcast %200 : vector<1x32xf32> to vector<16x32xf32>
    %222 = arith.addf %220, %221 : vector<16x32xf32>
    %c1_112 = arith.constant 1 : index
    %c0_113 = arith.constant 0 : index
    %c0_114 = arith.constant 0 : index
    %223 = vector.load %arg6[%c1_112, %c0_113, %c0_114] : memref<2x32x64xf32, #tpu.memory_space<vmem>>, vector<1x32x64xf32>
    %224 = vector.shape_cast %223 : vector<1x32x64xf32> to vector<32x64xf32>
    %cst_115 = arith.constant dense<0.000000e+00> : vector<16x64xf32>
    %225 = tpu.matmul %222, %224, %cst_115 {dimension_numbers = #tpu.dot_dimension_numbers<[1], [0], [0], [1], [0, 0, 1, 1], [], []>} : vector<16x32xf32>, vector<32x64xf32>, vector<16x64xf32> -> vector<16x64xf32>
    %c1_116 = arith.constant 1 : index
    %c0_117 = arith.constant 0 : index
    %c0_118 = arith.constant 0 : index
    %226 = vector.load %arg7[%c1_116, %c0_117, %c0_118] : memref<2x1x64xf32, #tpu.memory_space<vmem>>, vector<1x1x64xf32>
    %227 = vector.shape_cast %226 : vector<1x1x64xf32> to vector<1x64xf32>
    %228 = vector.broadcast %227 : vector<1x64xf32> to vector<16x64xf32>
    %229 = arith.addf %225, %228 : vector<16x64xf32>
    %cst_119 = arith.constant 5.000000e-01 : f32
    %230 = vector.broadcast %cst_119 : f32 to vector<16x64xf32>
    %231 = arith.mulf %230, %229 : vector<16x64xf32>
    %cst_120 = arith.constant 4.471500e-02 : f32
    %232 = vector.broadcast %cst_120 : f32 to vector<16x64xf32>
    %233 = arith.mulf %232, %229 : vector<16x64xf32>
    %234 = arith.mulf %233, %229 : vector<16x64xf32>
    %235 = arith.mulf %234, %229 : vector<16x64xf32>
    %236 = arith.addf %229, %235 : vector<16x64xf32>
    %cst_121 = arith.constant 0.797884583 : f32
    %237 = vector.broadcast %cst_121 : f32 to vector<16x64xf32>
    %238 = arith.mulf %237, %236 : vector<16x64xf32>
    %239 = math.tanh %238 : vector<16x64xf32>
    %cst_122 = arith.constant 1.000000e+00 : f32
    %240 = vector.broadcast %cst_122 : f32 to vector<16x64xf32>
    %241 = arith.addf %240, %239 : vector<16x64xf32>
    %242 = arith.mulf %231, %241 : vector<16x64xf32>
    %c1_123 = arith.constant 1 : index
    %c0_124 = arith.constant 0 : index
    %c0_125 = arith.constant 0 : index
    %243 = vector.load %arg8[%c1_123, %c0_124, %c0_125] : memref<2x64x32xf32, #tpu.memory_space<vmem>>, vector<1x64x32xf32>
    %244 = vector.shape_cast %243 : vector<1x64x32xf32> to vector<64x32xf32>
    %cst_126 = arith.constant dense<0.000000e+00> : vector<16x32xf32>
    %245 = tpu.matmul %242, %244, %cst_126 {dimension_numbers = #tpu.dot_dimension_numbers<[1], [0], [0], [1], [0, 0, 1, 1], [], []>} : vector<16x64xf32>, vector<64x32xf32>, vector<16x32xf32> -> vector<16x32xf32>
    %246 = vector.extract_strided_slice %151 {offsets = [3, 0], sizes = [1, 32], strides = [1, 1]} : vector<6x32xf32> to vector<1x32xf32>
    %247 = vector.broadcast %246 : vector<1x32xf32> to vector<16x32xf32>
    %248 = arith.addf %245, %247 : vector<16x32xf32>
    %249 = arith.addf %222, %248 : vector<16x32xf32>
    %250 = vector.extract_strided_slice %151 {offsets = [4, 0], sizes = [1, 32], strides = [1, 1]} : vector<6x32xf32> to vector<1x32xf32>
    %251 = vector.extract_strided_slice %151 {offsets = [5, 0], sizes = [1, 32], strides = [1, 1]} : vector<6x32xf32> to vector<1x32xf32>
    %cst_127 = arith.constant dense<0.000000e+00> : vector<16xf32>
    %252 = vector.multi_reduction <add>, %249, %cst_127 [1] : vector<16x32xf32> to vector<16xf32>
    %253 = vector.shape_cast %252 : vector<16xf32> to vector<16x1xf32>
    %cst_128 = arith.constant 3.200000e+01 : f32
    %254 = vector.broadcast %cst_128 : f32 to vector<16x1xf32>
    %255 = arith.divf %253, %254 : vector<16x1xf32>
    %256 = vector.broadcast %255 : vector<16x1xf32> to vector<16x32xf32>
    %257 = arith.subf %249, %256 : vector<16x32xf32>
    %258 = arith.mulf %257, %257 : vector<16x32xf32>
    %cst_129 = arith.constant dense<0.000000e+00> : vector<16xf32>
    %259 = vector.multi_reduction <add>, %258, %cst_129 [1] : vector<16x32xf32> to vector<16xf32>
    %260 = vector.shape_cast %259 : vector<16xf32> to vector<16x1xf32>
    %cst_130 = arith.constant 3.200000e+01 : f32
    %261 = vector.broadcast %cst_130 : f32 to vector<16x1xf32>
    %262 = arith.divf %260, %261 : vector<16x1xf32>
    %263 = vector.broadcast %255 : vector<16x1xf32> to vector<16x32xf32>
    %264 = arith.subf %249, %263 : vector<16x32xf32>
    %cst_131 = arith.constant 9.99999996E-13 : f32
    %265 = vector.broadcast %cst_131 : f32 to vector<16x1xf32>
    %266 = arith.addf %262, %265 : vector<16x1xf32>
    %267 = math.rsqrt %266 : vector<16x1xf32>
    %268 = vector.broadcast %267 : vector<16x1xf32> to vector<16x32xf32>
    %269 = arith.mulf %264, %268 : vector<16x32xf32>
    %270 = vector.broadcast %250 : vector<1x32xf32> to vector<16x32xf32>
    %271 = arith.mulf %269, %270 : vector<16x32xf32>
    %272 = vector.broadcast %251 : vector<1x32xf32> to vector<16x32xf32>
    %273 = arith.addf %271, %272 : vector<16x32xf32>
    %274 = tpu.iota {dimensions = array<i32: 0>} : vector<2x16xi32>
    %275 = tpu.iota {dimensions = array<i32: 1>} : vector<2x16xi32>
    %c8_i32 = arith.constant 8 : i32
    %276 = vector.broadcast %c8_i32 : i32 to vector<2x16xi32>
    %277 = arith.muli %274, %276 : vector<2x16xi32>
    %278 = arith.cmpi eq, %275, %277 : vector<2x16xi32>
    %279 = arith.extui %278 : vector<2x16xi1> to vector<2x16xi32>
    %280 = arith.sitofp %279 : vector<2x16xi32> to vector<2x16xf32>
    %cst_132 = arith.constant dense<0.000000e+00> : vector<2x32xf32>
    %281 = tpu.matmul %280, %273, %cst_132 {dimension_numbers = #tpu.dot_dimension_numbers<[1], [0], [0], [1], [0, 0, 1, 1], [], []>} : vector<2x16xf32>, vector<16x32xf32>, vector<2x32xf32> -> vector<2x32xf32>
    %c0_133 = arith.constant 0 : index
    %c0_134 = arith.constant 0 : index
    %282 = vector.load %arg11[%c0_133, %c0_134] : memref<32x32xf32, #tpu.memory_space<vmem>>, vector<32x32xf32>
    %cst_135 = arith.constant dense<0.000000e+00> : vector<2x32xf32>
    %283 = tpu.matmul %281, %282, %cst_135 {dimension_numbers = #tpu.dot_dimension_numbers<[1], [0], [0], [1], [0, 0, 1, 1], [], []>} : vector<2x32xf32>, vector<32x32xf32>, vector<2x32xf32> -> vector<2x32xf32>
    %c2_136 = arith.constant 2 : index
    %c0_137 = arith.constant 0 : index
    %284 = vector.load %arg10[%c2_136, %c0_137] : memref<3x32xf32, #tpu.memory_space<vmem>>, vector<1x32xf32>
    %285 = vector.broadcast %284 : vector<1x32xf32> to vector<2x32xf32>
    %286 = arith.addf %283, %285 : vector<2x32xf32>
    %287 = math.tanh %286 : vector<2x32xf32>
    %c0_138 = arith.constant 0 : index
    %c0_139 = arith.constant 0 : index
    %288 = vector.load %arg12[%c0_138, %c0_139] : memref<2x32xf32, #tpu.memory_space<vmem>>, vector<2x32xf32>
    tpu.vector_store %arg12[%c0_138, %c0_139], %287 {strides = array<i32>} : memref<2x32xf32, #tpu.memory_space<vmem>>, vector<2x32xf32>,
    return
  }
  func.func @transform_0(%arg0: i32) -> (i32, i32) {
    %c0_i32 = arith.constant 0 : i32
    %c0_i32_0 = arith.constant 0 : i32
    %c0_i32_1 = arith.constant 0 : i32
    return %c0_i32, %c0_i32_0 : i32, i32
  }
  func.func @transform_1(%arg0: i32) -> (i32, i32) {
    %c0_i32 = arith.constant 0 : i32
    %c0_i32_0 = arith.constant 0 : i32
    %c0_i32_1 = arith.constant 0 : i32
    return %c0_i32, %c0_i32_0 : i32, i32
  }
  func.func @transform_2(%arg0: i32) -> (i32, i32, i32, i32) {
    %c0_i32 = arith.constant 0 : i32
    %c0_i32_0 = arith.constant 0 : i32
    %c0_i32_1 = arith.constant 0 : i32
    %c0_i32_2 = arith.constant 0 : i32
    %c0_i32_3 = arith.constant 0 : i32
    return %c0_i32, %c0_i32_0, %c0_i32_1, %c0_i32_2 : i32, i32, i32, i32
  }
  func.func @transform_3(%arg0: i32) -> (i32, i32, i32) {
    %c0_i32 = arith.constant 0 : i32
    %c0_i32_0 = arith.constant 0 : i32
    %c0_i32_1 = arith.constant 0 : i32
    %c0_i32_2 = arith.constant 0 : i32
    return %c0_i32, %c0_i32_0, %c0_i32_1 : i32, i32, i32
  }
  func.func @transform_4(%arg0: i32) -> (i32, i32, i32, i32) {
    %c0_i32 = arith.constant 0 : i32
    %c0_i32_0 = arith.constant 0 : i32
    %c0_i32_1 = arith.constant 0 : i32
    %c0_i32_2 = arith.constant 0 : i32
    %c0_i32_3 = arith.constant 0 : i32
    return %c0_i32, %c0_i32_0, %c0_i32_1, %c0_i32_2 : i32, i32, i32, i32
  }
  func.func @transform_5(%arg0: i32) -> (i32, i32, i32) {
    %c0_i32 = arith.constant 0 : i32
    %c0_i32_0 = arith.constant 0 : i32
    %c0_i32_1 = arith.constant 0 : i32
    %c0_i32_2 = arith.constant 0 : i32
    return %c0_i32, %c0_i32_0, %c0_i32_1 : i32, i32, i32
  }
  func.func @transform_6(%arg0: i32) -> (i32, i32, i32) {
    %c0_i32 = arith.constant 0 : i32
    %c0_i32_0 = arith.constant 0 : i32
    %c0_i32_1 = arith.constant 0 : i32
    %c0_i32_2 = arith.constant 0 : i32
    return %c0_i32, %c0_i32_0, %c0_i32_1 : i32, i32, i32
  }
  func.func @transform_7(%arg0: i32) -> (i32, i32, i32) {
    %c0_i32 = arith.constant 0 : i32
    %c0_i32_0 = arith.constant 0 : i32
    %c0_i32_1 = arith.constant 0 : i32
    %c0_i32_2 = arith.constant 0 : i32
    return %c0_i32, %c0_i32_0, %c0_i32_1 : i32, i32, i32
  }
  func.func @transform_8(%arg0: i32) -> (i32, i32, i32) {
    %c0_i32 = arith.constant 0 : i32
    %c0_i32_0 = arith.constant 0 : i32
    %c0_i32_1 = arith.constant 0 : i32
    %c0_i32_2 = arith.constant 0 : i32
    return %c0_i32, %c0_i32_0, %c0_i32_1 : i32, i32, i32
  }
  func.func @transform_9(%arg0: i32) -> (i32, i32) {
    %c0_i32 = arith.constant 0 : i32
    %c0_i32_0 = arith.constant 0 : i32
    %c0_i32_1 = arith.constant 0 : i32
    return %c0_i32, %c0_i32_0 : i32, i32
  }
  func.func @transform_10(%arg0: i32) -> (i32, i32) {
    %c0_i32 = arith.constant 0 : i32
    %c0_i32_0 = arith.constant 0 : i32
    %c0_i32_1 = arith.constant 0 : i32
    return %c0_i32, %c0_i32_0 : i32, i32
  }
  func.func @transform_11(%arg0: i32) -> (i32, i32) {
    %c0_i32 = arith.constant 0 : i32
    %c0_i32_0 = arith.constant 0 : i32
    %c0_i32_1 = arith.constant 0 : i32
    return %c0_i32, %c0_i32_0 : i32, i32
  }
}

</mosaic_0001>

<bundles_post_ra>
// kernel: kf_text_encoder_forward.1
= control target key start
LH: loop header
LB: loop body
LE: loop exit
PB: predicated region body
PF: predicated region fallthrough
CT: control target
= control target key end

     0   :  { %vm51_vm0 = vcmask 261120   ;;  %s6877_s0 = inlined_call_operand.vmem [shape: f32[16,32], index: 0, kind: input, shape index: {}]   ;;  %s6878_s1 = inlined_call_operand.vmem [shape: f32[64,64], index: 1, kind: input, shape index: {}]   ;;  %s6879_s2 = inlined_call_operand.vmem [shape: f32[6,4,32,8], index: 2, kind: input, shape index: {}]   ;;  %s6880_s3 = inlined_call_operand.vmem [shape: f32[6,64,8], index: 3, kind: input, shape index: {}]   ;;  %s6881_s4 = inlined_call_operand.vmem [shape: f32[2,4,8,32], index: 4, kind: input, shape index: {}]   ;;  %s6882_s5 = inlined_call_operand.vmem [shape: f32[2,32,64], index: 5, kind: input, shape index: {}]   ;;  %s6883_s6 = inlined_call_operand.vmem [shape: f32[2,1,64], index: 6, kind: input, shape index: {}]   ;;  %s6884_s7 = inlined_call_operand.vmem [shape: f32[2,64,32], index: 7, kind: input, shape index: {}]   ;;  %s6885_s8 = inlined_call_operand.vmem [shape: f32[2,6,32], index: 8, kind: input, shape index: {}]   ;;  %s6886_s9 = inlined_call_operand.vmem [shape: f32[3,32], index: 9, kind: input, shape index: {}]   ;;  %s6887_s10 = inlined_call_operand.vmem [shape: f32[32,32], index: 10, kind: input, shape index: {}]   ;;  %s6888_s11 = inlined_call_operand.hbm [shape: f32[2,32], index: 11, kind: output, shape index: {}]  }
   0x1   :  { %v47_v0 = vld [vmem:[%s6877_s0] sm:$0xff]  ;;  %v48_v1 = vld [vmem:[%s6877_s0 + $0x8] sm:$0xff] }
   0x2   :  { %16 = vsyncpa [#allocation3], 0  ;;  %v52_v2 = vsel %vm51_vm0, %v47_v0, 0.0  ;;  %v55_v3 = vsel %vm51_vm0, %v48_v1, 0.0  ;;  %v92_v14 = vld [vmem:[%s6879_s2] sm:$0xff]  ;;  %v93_v15 = vld [vmem:[%s6879_s2 + $0x8] sm:$0xff] }
   0x3   :  { %53 = vadd.xlane.f32.xlu0 %v52_v2  ;;  %v96_v16 = vld [vmem:[%s6879_s2 + $0x20] sm:$0xff]  ;;  %v5361_v17 = vpack.c.bf16 %v93_v15, %v92_v14  ;;  %v97_v18 = vld [vmem:[%s6879_s2 + $0x28] sm:$0xff]  ;;  %v94_v20 = vld [vmem:[%s6879_s2 + $0x10] sm:$0xff]  ;;  %vm1098_vm1 = vcmask 64512   ;;  %vm1268_vm3 = vcmask 523264   ;;  %vm5821_vm4 = vmmov 0  }
   0x4   :  { %v5369_v19 = vpack.c.bf16 %v97_v18, %v96_v16  ;;  %v95_v21 = vld [vmem:[%s6879_s2 + $0x18] sm:$0xff]  ;;  %v98_v22 = vld [vmem:[%s6879_s2 + $0x30] sm:$0xff]  ;;  %v100_v26 = vld [vmem:[%s6879_s2 + $0x40] sm:$0xff]  ;;  %vm4156_vm6 = vcmask 130048   ;;  %vm4313_vm7 = vcmask 254976  }
   0x5   :  { %5362 = vmatprep.subr.bf16.mxu0 %v5361_v17  ;;  %v5365_v23 = vpack.c.bf16 %v95_v21, %v94_v20  ;;  %v99_v24 = vld [vmem:[%s6879_s2 + $0x38] sm:$0xff]  ;;  %v101_v27 = vld [vmem:[%s6879_s2 + $0x48] sm:$0xff]  ;;  %v104_v28 = vld [vmem:[%s6879_s2 + $0x60] sm:$0xff] }
   0x6   :  { %5370 = vmatprep.subr.bf16.mxu1 %v5369_v19  ;;  %5364 = vmatpush3.bf16.msra.mxu0 %v5361_v17  ;;  %v5373_v25 = vpack.c.bf16 %v99_v24, %v98_v22  ;;  %v5377_v29 = vpack.c.bf16 %v101_v27, %v100_v26  ;;  %v105_v30 = vld [vmem:[%s6879_s2 + $0x68] sm:$0xff]  ;;  %v4329_v39 = vld [vmem:[%s6886_s9] ss:$0 sm:$0xff]  ;;  %v4330_v41 = vld [vmem:[%s6886_s9 + $0x1] ss:$0 sm:$0xff] }
   0x7   :  { %56 = vadd.xlane.f32.xlu0 %v55_v3  ;;  %5372 = vmatpush3.bf16.msra.mxu1 %v5369_v19  ;;  %v5385_v31 = vpack.c.bf16 %v105_v30, %v104_v28  ;;  %v102_v46 = vld [vmem:[%s6879_s2 + $0x50] sm:$0xff]  ;;  %v103_v48 = vld [vmem:[%s6879_s2 + $0x58] sm:$0xff]  ;;  %v4339_v52 = vld [vmem:[%s6879_s2 + $0x80] sm:$0xff] }
   0x8   :  { %5366 = vmatprep.subr.bf16.mxu0 %v5365_v23  ;;  %5374 = vmatprep.subr.bf16.mxu1 %v5373_v25  ;;  %v106_v49 = vld [vmem:[%s6879_s2 + $0x70] sm:$0xff]  ;;  %v107_v50 = vld [vmem:[%s6879_s2 + $0x78] sm:$0xff]  ;;  %v5381_v53 = vpack.c.bf16 %v103_v48, %v102_v46  ;;  %v4340_v55 = vld [vmem:[%s6879_s2 + $0x88] sm:$0xff] }
   0x9   :  { %v5389_v54 = vpack.c.bf16 %v107_v50, %v106_v49  ;;  %v4343_v56 = vld [vmem:[%s6879_s2 + $0xa0] sm:$0xff]  ;;  %v4344_v57 = vld [vmem:[%s6879_s2 + $0xa8] sm:$0xff]  ;;  %v5393_v58 = vpack.c.bf16 %v4340_v55, %v4339_v52  ;;  %v4341_v60 = vld [vmem:[%s6879_s2 + $0x90] sm:$0xff] }
   0xa   :  { %5368 = vmatpush3.bf16.msra.mxu0 %v5365_v23  ;;  %v5401_v59 = vpack.c.bf16 %v4344_v57, %v4343_v56  ;;  %v4342_v61 = vld [vmem:[%s6879_s2 + $0x98] sm:$0xff]  ;;  %v4345_v62 = vld [vmem:[%s6879_s2 + $0xb0] sm:$0xff]  ;;  %v4347_v2 = vld [vmem:[%s6879_s2 + $0xc0] sm:$0xff] }
   0xb   :  { %5376 = vmatpush3.bf16.msra.mxu1 %v5373_v25  ;;  %5378 = vmatprep.subr.bf16.mxu0 %v5377_v29  ;;  %v4346_v63 = vld [vmem:[%s6879_s2 + $0xb8] sm:$0xff]  ;;  %v4348_v3 = vld [vmem:[%s6879_s2 + $0xc8] sm:$0xff]  ;;  %v4375_v16 = vld [vmem:[%s6879_s2 + $0x120] sm:$0xff] }
   0xc   :  { %5386 = vmatprep.subr.bf16.mxu1 %v5385_v31  ;;  %v4372_v14 = vld [vmem:[%s6879_s2 + $0x108] sm:$0xff]  ;;  %v4373_v20 = vld [vmem:[%s6879_s2 + $0x110] sm:$0xff]  ;;  %v4374_v21 = vld [vmem:[%s6879_s2 + $0x118] sm:$0xff] }
   0xd   :  { %v4376_v17 = vld [vmem:[%s6879_s2 + $0x128] sm:$0xff]  ;;  %v4377_v22 = vld [vmem:[%s6879_s2 + $0x130] sm:$0xff]  ;;  %v4378_v23 = vld [vmem:[%s6879_s2 + $0x138] sm:$0xff]  ;;  %v5429_v24 = vpack.c.bf16 %v4374_v21, %v4373_v20 }
   0xe   :  { %v5433_v19 = vpack.c.bf16 %v4376_v17, %v4375_v16  ;;  %v4379_v25 = vld [vmem:[%s6879_s2 + $0x140] sm:$0xff]  ;;  %v4380_v26 = vld [vmem:[%s6879_s2 + $0x148] sm:$0xff]  ;;  %v5437_v27 = vpack.c.bf16 %v4378_v23, %v4377_v22  ;;  %v4366_v50 = vld [vmem:[%s6880_s3 + $0x58] sm:$0xff] }
   0xf   :  { %v4383_v28 = vld [vmem:[%s6879_s2 + $0x160] sm:$0xff]  ;;  %v5441_v30 = vpack.c.bf16 %v4380_v26, %v4379_v25  ;;  %v4364_v49 = vld [vmem:[%s6880_s3 + $0x48] sm:$0xff]  ;;  %vm6128_vm2 = vmpackc.low %vm1098_vm1, %vm1098_vm1 }
  0x10   :  { %v4363_v52 = vld [vmem:[%s6880_s3 + $0x40] sm:$0xff]  ;;  %v4398_v16 = vld [vmem:[%s6880_s3 + $0x98] sm:$0xff] }
  0x11   :  { %v4395_v17 = vld [vmem:[%s6880_s3 + $0x80] sm:$0xff] }
  0x90   :  { %v54_v4 = vpop.xlane.xlu0 %53 }
  0x91   :  { %v59_v5 = vmul.f32 0.03125, %v54_v4  ;;  %v4351_v4 = vld [vmem:[%s6879_s2 + $0xe0] sm:$0xff] }
  0x93   :  { %v61_v6 = vsub.f32 %v47_v0, %v59_v5  ;;  %v5397_v0 = vpack.c.bf16 %v4342_v61, %v4341_v60  ;;  %v4352_v5 = vld [vmem:[%s6879_s2 + $0xe8] sm:$0xff] }
  0x94   :  { %v57_v7 = vpop.xlane.xlu0 %56 }
  0x95   :  { %v60_v8 = vmul.f32 0.03125, %v57_v7  ;;  %v63_v9 = vmul.f32 %v61_v6, %v61_v6  ;;  %v5417_v7 = vpack.c.bf16 %v4352_v5, %v4351_v4  ;;  %v4369_v5 = vld [vmem:[%s6880_s3 + $0x70] sm:$0xff] }
  0x97   :  { %v62_v10 = vsub.f32 %v48_v1, %v60_v8  ;;  %v65_v11 = vsel %vm51_vm0, %v63_v9, 0.0  ;;  %v5405_v1 = vpack.c.bf16 %v4346_v63, %v4345_v62  ;;  %v4349_v8 = vld [vmem:[%s6879_s2 + $0xd0] sm:$0xff]  ;;  %v4350_v9 = vld [vmem:[%s6879_s2 + $0xd8] sm:$0xff] }
  0x98   :  { %66 = vadd.xlane.f32.xlu1 %v65_v11  ;;  %v4354_v11 = vld [vmem:[%s6879_s2 + $0xf8] sm:$0xff] }
  0x99   :  { %v64_v12 = vmul.f32 %v62_v10, %v62_v10 }
  0x9b   :  { %v68_v13 = vsel %vm51_vm0, %v64_v12, 0.0  ;;  %v5413_v12 = vpack.c.bf16 %v4350_v9, %v4349_v8 }
  0x9c   :  { %69 = vadd.xlane.f32.xlu1 %v68_v13  ;;  %v4371_v13 = vld [vmem:[%s6879_s2 + $0x100] sm:$0xff] }
  0x9d   :  { %v5425_v18 = vpack.c.bf16 %v4372_v14, %v4371_v13 }
 0x125   :  { %v67_v32 = vpop.xlane.xlu1 %66 }
 0x126   :  { %v71_v33 = vmul.f32 0.03125, %v67_v32  ;;  %v4381_v32 = vld [vmem:[%s6879_s2 + $0x150] sm:$0xff] }
 0x128   :  { %v73_v34 = vadd.f32 1e-12, %v71_v33  ;;  %v4382_v33 = vld [vmem:[%s6879_s2 + $0x158] sm:$0xff] }
 0x129   :  { %v70_v35 = vpop.xlane.xlu1 %69 }
 0x12a   :  { %5694 = vrsqrt.f32 %v73_v34  ;;  %v72_v36 = vmul.f32 0.03125, %v70_v35  ;;  %v4385_v34 = vld [vmem:[%s6879_s2 + $0x170] sm:$0xff]  ;;  %v4386_v35 = vld [vmem:[%s6879_s2 + $0x178] sm:$0xff] }
 0x12c   :  { %v74_v37 = vadd.f32 1e-12, %v72_v36  ;;  %v5445_v36 = vpack.c.bf16 %v4382_v33, %v4381_v32  ;;  %v4401_v33 = vld [vmem:[%s6880_s3 + $0xb0] sm:$0xff] }
 0x12e   :  { %5696 = vrsqrt.f32 %v74_v37  ;;  %v5453_v37 = vpack.c.bf16 %v4386_v35, %v4385_v34 }
 0x134   :  { %v5695_v38 = vpop.eup %5694 }
 0x135   :  { %v77_v40 = vmul.f32 %v5695_v38, %v61_v6  ;;  %v5409_v6 = vpack.c.bf16 %v4348_v3, %v4347_v2  ;;  %v414_v38 = vld [vmem:[%s6880_s3] sm:$0xff]  ;;  %v4370_v2 = vld [vmem:[%s6880_s3 + $0x78] sm:$0xff] }
 0x136   :  { %v4367_v3 = vld [vmem:[%s6880_s3 + $0x60] sm:$0xff] }
 0x137   :  { %v83_v42 = vmul.f32 %v4329_v39, %v77_v40 }
 0x138   :  { %v5697_v43 = vpop.eup %5696 }
 0x139   :  { %v5936_v44 = vadd.f32 %v4330_v41, %v83_v42  ;;  %v78_v45 = vmul.f32 %v5697_v43, %v62_v10  ;;  %v4353_v10 = vld [vmem:[%s6879_s2 + $0xf0] sm:$0xff] }
 0x13a   :  { %v5421_v15 = vpack.c.bf16 %v4354_v11, %v4353_v10 }
 0x13b   :  { %v84_v47 = vmul.f32 %v4329_v39, %v78_v45  ;;  %4875 = vmatprep.mubr.msk.f32.mxu0 %vm51_vm0, %v5936_v44  ;;  %4886 = vmatprep.mubr.msk.f32.mxu1 %vm51_vm0, %v5936_v44 }
 0x13d   :  { %v5954_v51 = vadd.f32 %v4330_v41, %v84_v47 }
 0x13f   :  { %4876 = vmatmul.mubr.msk.f32.vlgmr.msra.gmra.mrb[0].mxu0 %vm51_vm0, %v5954_v51  ;;  %4887 = vmatmul.mubr.msk.f32.vlgmr.msra.gmra.mrb[0].mxu1 %vm51_vm0, %v5954_v51 }
 0x140   :  { %5380 = vmatpush3.bf16.msra.mxu0 %v5377_v29  ;;  %5388 = vmatpush3.bf16.msra.mxu1 %v5385_v31  ;;  %v4384_v29 = vld [vmem:[%s6879_s2 + $0x168] sm:$0xff] }
 0x141   :  { %4897 = vmatprep.mubr.msk.f32.mxu0 %vm51_vm0, %v5936_v44  ;;  %4908 = vmatprep.mubr.msk.f32.mxu1 %vm51_vm0, %v5936_v44  ;;  %v5449_v31 = vpack.c.bf16 %v4384_v29, %v4383_v28  ;;  %v4400_v29 = vld [vmem:[%s6880_s3 + $0xa8] sm:$0xff] }
 0x142   :  { %5382 = vmatprep.subr.bf16.mxu0 %v5381_v53  ;;  %5390 = vmatprep.subr.bf16.mxu1 %v5389_v54 }
 0x144   :  { %5384 = vmatpush3.bf16.msra.mxu0 %v5381_v53  ;;  %5392 = vmatpush3.bf16.msra.mxu1 %v5389_v54  ;;  %v4365_v54 = vld [vmem:[%s6880_s3 + $0x50] sm:$0xff] }
 0x145   :  { %5394 = vmatprep.subr.bf16.mxu0 %v5393_v58  ;;  %5402 = vmatprep.subr.bf16.mxu1 %v5401_v59 }
 0x147   :  { %4898 = vmatmul.mubr.msk.f32.vlgmr.msra.gmra.mrb[2].mxu0 %vm51_vm0, %v5954_v51  ;;  %4909 = vmatmul.mubr.msk.f32.vlgmr.msra.gmra.mrb[2].mxu1 %vm51_vm0, %v5954_v51 }
 0x148   :  { %5396 = vmatpush3.bf16.msra.mxu0 %v5393_v58  ;;  %4919 = vmatprep.mubr.msk.f32.mxu0 %vm51_vm0, %v5936_v44 }
 0x149   :  { %5404 = vmatpush3.bf16.msra.mxu1 %v5401_v59  ;;  %4930 = vmatprep.mubr.msk.f32.mxu1 %vm51_vm0, %v5936_v44 }
 0x14a   :  { %5398 = vmatprep.subr.bf16.mxu0 %v5397_v0  ;;  %5406 = vmatprep.subr.bf16.mxu1 %v5405_v1 }
 0x14c   :  { %5400 = vmatpush3.bf16.msra.mxu0 %v5397_v0 }
 0x14d   :  { %5408 = vmatpush3.bf16.msra.mxu1 %v5405_v1  ;;  %5410 = vmatprep.subr.bf16.mxu0 %v5409_v6  ;;  %v4368_v1 = vld [vmem:[%s6880_s3 + $0x68] sm:$0xff] }
 0x14e   :  { %5418 = vmatprep.subr.bf16.mxu1 %v5417_v7 }
 0x14f   :  { %4920 = vmatmul.mubr.msk.f32.vlgmr.msra.gmra.mrb[4].mxu0 %vm51_vm0, %v5954_v51 }
 0x150   :  { %4931 = vmatmul.mubr.msk.f32.vlgmr.msra.gmra.mrb[4].mxu1 %vm51_vm0, %v5954_v51  ;;  %5412 = vmatpush3.bf16.msra.mxu0 %v5409_v6 }
 0x151   :  { %4941 = vmatprep.mubr.msk.f32.mxu0 %vm51_vm0, %v5936_v44  ;;  %5420 = vmatpush3.bf16.msra.mxu1 %v5417_v7 }
 0x152   :  { %4952 = vmatprep.mubr.msk.f32.mxu1 %vm51_vm0, %v5936_v44  ;;  %5414 = vmatprep.subr.bf16.mxu0 %v5413_v12 }
 0x153   :  { %5422 = vmatprep.subr.bf16.mxu1 %v5421_v15 }
 0x154   :  { %5416 = vmatpush3.bf16.msra.mxu0 %v5413_v12 }
 0x155   :  { %5424 = vmatpush3.bf16.msra.mxu1 %v5421_v15  ;;  %5426 = vmatprep.subr.bf16.mxu0 %v5425_v18  ;;  %v4396_v15 = vld [vmem:[%s6880_s3 + $0x88] sm:$0xff] }
 0x156   :  { %5434 = vmatprep.subr.bf16.mxu1 %v5433_v19 }
 0x157   :  { %4942 = vmatmul.mubr.msk.f32.vlgmr.msra.gmra.mrb[6].mxu0 %vm51_vm0, %v5954_v51 }
 0x158   :  { %4953 = vmatmul.mubr.msk.f32.vlgmr.msra.gmra.mrb[6].mxu1 %vm51_vm0, %v5954_v51  ;;  %5428 = vmatpush3.bf16.msra.mxu0 %v5425_v18 }
 0x159   :  { %4963 = vmatprep.mubr.msk.f32.mxu0 %vm51_vm0, %v5936_v44  ;;  %5436 = vmatpush3.bf16.msra.mxu1 %v5433_v19  ;;  %v4397_v19 = vld [vmem:[%s6880_s3 + $0x90] sm:$0xff] }
 0x15a   :  { %4974 = vmatprep.mubr.msk.f32.mxu1 %vm51_vm0, %v5936_v44  ;;  %5430 = vmatprep.subr.bf16.mxu0 %v5429_v24 }
 0x15b   :  { %5438 = vmatprep.subr.bf16.mxu1 %v5437_v27 }
 0x15c   :  { %5432 = vmatpush3.bf16.msra.mxu0 %v5429_v24 }
 0x15d   :  { %5440 = vmatpush3.bf16.msra.mxu1 %v5437_v27  ;;  %5442 = vmatprep.subr.bf16.mxu0 %v5441_v30 }
 0x15e   :  { %5450 = vmatprep.subr.bf16.mxu1 %v5449_v31 }
 0x15f   :  { %4964 = vmatmul.mubr.msk.f32.vlgmr.msra.gmra.mrb[8].mxu0 %vm51_vm0, %v5954_v51 }
 0x160   :  { %4975 = vmatmul.mubr.msk.f32.vlgmr.msra.gmra.mrb[8].mxu1 %vm51_vm0, %v5954_v51  ;;  %5444 = vmatpush3.bf16.msra.mxu0 %v5441_v30  ;;  %v4402_v30 = vld [vmem:[%s6880_s3 + $0xb8] sm:$0xff] }
 0x161   :  { %4985 = vmatprep.mubr.msk.f32.mxu0 %vm51_vm0, %v5936_v44  ;;  %5452 = vmatpush3.bf16.msra.mxu1 %v5449_v31  ;;  %v4399_v31 = vld [vmem:[%s6880_s3 + $0xa0] sm:$0xff] }
 0x162   :  { %4996 = vmatprep.mubr.msk.f32.mxu1 %vm51_vm0, %v5936_v44  ;;  %5446 = vmatprep.subr.bf16.mxu0 %v5445_v36 }
 0x163   :  { %5454 = vmatprep.subr.bf16.mxu1 %v5453_v37 }
 0x164   :  { %5448 = vmatpush3.bf16.msra.mxu0 %v5445_v36 }
 0x165   :  { %5456 = vmatpush3.bf16.msra.mxu1 %v5453_v37 }
 0x167   :  { %4986 = vmatmul.mubr.msk.f32.vlgmr.msra.gmra.mrb[10].mxu0 %vm51_vm0, %v5954_v51 }
 0x168   :  { %4997 = vmatmul.mubr.msk.f32.vlgmr.msra.gmra.mrb[10].mxu1 %vm51_vm0, %v5954_v51 }
 0x212   :  { %v6099_v39 = vpop.f32.mrb[0].mxu0  ;;  %v6101_v40 = vpop.f32.mrb[0].mxu1 }
 0x213   :  { %v180_v41 = vpop.f32.mrb[1].mxu0  ;;  %v6103_v42 = vpop.f32.mrb[1].mxu1 }
 0x214   :  { %v422_v43 = vadd.f32 %v414_v38, %v180_v41 }
 0x216   :  { %5015 = vmatprep.mubr.msk.f32.mxu0 %vm1098_vm1, %v422_v43 }
 0x21a   :  { %v6106_v45 = vpop.f32.mrb[2].mxu0  ;;  %v6108_v46 = vpop.f32.mrb[2].mxu1 }
 0x21b   :  { %v6110_v47 = vpop.f32.mrb[3].mxu0  ;;  %v6112_v48 = vpop.f32.mrb[3].mxu1 }
 0x222   :  { %v4921_v53 = vpop.f32.mrb[4].mxu0 }
 0x223   :  { %v757_v55 = vadd.f32 %v4921_v53, %v4364_v49  ;;  %v4932_v56 = vpop.f32.mrb[4].mxu1  ;;  %v513_v57 = vpop.f32.mrb[5].mxu0  ;;  %v416_v53 = vld [vmem:[%s6880_s3 + $0x10] sm:$0xff] }
 0x224   :  { %v759_v58 = vadd.f32 %v4932_v56, %v4366_v50  ;;  %v756_v59 = vadd.f32 %v4363_v52, %v513_v57  ;;  %v588_v60 = vpop.f32.mrb[5].mxu1  ;;  %v415_v52 = vld [vmem:[%s6880_s3 + $0x8] sm:$0xff]  ;;  %v424_v56 = vadd.f32 %v416_v53, %v6103_v42  ;;  %v418_v57 = vld [vmem:[%s6880_s3 + $0x20] sm:$0xff]  ;;  %v420_v42 = vld [vmem:[%s6880_s3 + $0x30] sm:$0xff] }
 0x225   :  { %v758_v61 = vadd.f32 %v4365_v54, %v588_v60  ;;  %v423_v54 = vadd.f32 %v6099_v39, %v415_v52  ;;  %v419_v39 = vld [vmem:[%s6880_s3 + $0x28] sm:$0xff] }
 0x226   :  { %v5457_v63 = vpack.c.bf16 %v757_v55, %v756_v59  ;;  %v417_v55 = vld [vmem:[%s6880_s3 + $0x18] sm:$0xff]  ;;  %v426_v59 = vadd.f32 %v418_v57, %v6110_v47  ;;  %v427_v60 = vadd.f32 %v6106_v45, %v419_v39 }
 0x227   :  { %v5463_v0 = vpack.c.bf16 %v759_v58, %v758_v61  ;;  %v425_v58 = vadd.f32 %v6101_v40, %v417_v55  ;;  %v421_v40 = vld [vmem:[%s6880_s3 + $0x38] sm:$0xff]  ;;  %v428_v61 = vadd.f32 %v420_v42, %v6112_v48 }
 0x228   :  { %5459 = vmatprep.subr.msk.bf16.mxu0 %vm6128_vm2, %v5457_v63  ;;  %v429_v47 = vadd.f32 %v6108_v46, %v421_v40  ;;  %v42_v46 = vld [vmem:[%s6878_s1 + $0x18] sm:$0xff] }
 0x229   :  { %5462 = vmatpush3.bf16.xpose.msk.msra.mxu0 %vm6128_vm2, %v5457_v63 }
 0x22a   :  { %v4943_v4 = vpop.f32.mrb[6].mxu0  ;;  %5465 = vmatprep.subr.msk.bf16.mxu0 %vm6128_vm2, %v5463_v0 }
 0x22b   :  { %v761_v6 = vadd.f32 %v4943_v4, %v4368_v1  ;;  %v4954_v7 = vpop.f32.mrb[6].mxu1  ;;  %v663_v8 = vpop.f32.mrb[7].mxu0 }
 0x22c   :  { %v763_v9 = vadd.f32 %v4954_v7, %v4370_v2  ;;  %v760_v10 = vadd.f32 %v4367_v3, %v663_v8  ;;  %v738_v11 = vpop.f32.mrb[7].mxu1  ;;  %v39_v2 = vld [vmem:[%s6878_s1] sm:$0xff] }
 0x22d   :  { %v762_v12 = vadd.f32 %v4369_v5, %v738_v11 }
 0x22e   :  { %v5469_v13 = vpack.c.bf16 %v761_v6, %v760_v10 }
 0x22f   :  { %v5475_v14 = vpack.c.bf16 %v763_v9, %v762_v12  ;;  %v41_v9 = vld [vmem:[%s6878_s1 + $0x10] sm:$0xff] }
 0x231   :  { %5468 = vmatpush3.bf16.xpose.msk.msra.mxu0 %vm6128_vm2, %v5463_v0  ;;  %v40_v0 = vld [vmem:[%s6878_s1 + $0x8] sm:$0xff] }
 0x232   :  { %v4965_v18 = vpop.f32.mrb[8].mxu0  ;;  %5471 = vmatprep.subr.msk.bf16.mxu0 %vm6128_vm2, %v5469_v13 }
 0x233   :  { %v1091_v20 = vadd.f32 %v4965_v18, %v4396_v15  ;;  %v4976_v21 = vpop.f32.mrb[8].mxu1  ;;  %v847_v22 = vpop.f32.mrb[9].mxu0  ;;  %v44_v15 = vld [vmem:[%s6878_s1 + $0x28] sm:$0xff] }
 0x234   :  { %v1093_v23 = vadd.f32 %v4976_v21, %v4398_v16  ;;  %v1090_v24 = vadd.f32 %v4395_v17, %v847_v22  ;;  %v922_v25 = vpop.f32.mrb[9].mxu1 }
 0x235   :  { %v1092_v26 = vadd.f32 %v4397_v19, %v922_v25  ;;  %v43_v19 = vld [vmem:[%s6878_s1 + $0x20] sm:$0xff]  ;;  %v46_v25 = vld [vmem:[%s6878_s1 + $0x38] sm:$0xff] }
 0x236   :  { %v5481_v27 = vpack.c.bf16 %v1091_v20, %v1090_v24 }
 0x237   :  { %v5485_v28 = vpack.c.bf16 %v1093_v23, %v1092_v26 }
 0x238   :  { %5482 = vmatprep.subr.bf16.mxu1 %v5481_v27 }
 0x239   :  { %5474 = vmatpush3.bf16.xpose.msk.msra.mxu0 %vm6128_vm2, %v5469_v13  ;;  %5484 = vmatpush3.bf16.msra.mxu1 %v5481_v27 }
 0x23a   :  { %v4987_v32 = vpop.f32.mrb[10].mxu0  ;;  %5477 = vmatprep.subr.msk.bf16.mxu0 %vm6128_vm2, %v5475_v14  ;;  %5486 = vmatprep.subr.bf16.mxu1 %v5485_v28 }
 0x23b   :  { %v1095_v34 = vadd.f32 %v4987_v32, %v4400_v29  ;;  %v4998_v35 = vpop.f32.mrb[10].mxu1  ;;  %v997_v36 = vpop.f32.mrb[11].mxu0  ;;  %v45_v29 = vld [vmem:[%s6878_s1 + $0x30] sm:$0xff] }
 0x23c   :  { %v1097_v37 = vadd.f32 %v4998_v35, %v4402_v30  ;;  %v1094_v38 = vadd.f32 %v4399_v31, %v997_v36  ;;  %v1072_v41 = vpop.f32.mrb[11].mxu1 }
 0x23d   :  { %v1096_v43 = vadd.f32 %v4401_v33, %v1072_v41  ;;  %5488 = vmatpush3.bf16.msra.mxu1 %v5485_v28 }
 0x23e   :  { %v5489_v49 = vpack.c.bf16 %v1095_v34, %v1094_v38 }
 0x23f   :  { %v5493_v50 = vpack.c.bf16 %v1097_v37, %v1096_v43 }
 0x240   :  { %5490 = vmatprep.subr.bf16.mxu1 %v5489_v49 }
 0x241   :  { %5480 = vmatpush3.bf16.xpose.msk.msra.mxu0 %vm6128_vm2, %v5475_v14  ;;  %5492 = vmatpush3.bf16.msra.mxu1 %v5489_v49 }
 0x242   :  { %5494 = vmatprep.subr.bf16.mxu1 %v5493_v50 }
 0x245   :  { %5496 = vmatpush3.bf16.msra.mxu1 %v5493_v50 }
 0x248   :  { %5016 = vmatmul.mubr.msk.f32.vlgmr.msra.gmra.mrb[12].mxu0 %vm1098_vm1, %v423_v54 }
 0x249   :  { %5018 = vmatprep.mubr.msk.f32.mxu0 %vm1098_vm1, %v424_v56 }
 0x24c   :  { %5019 = vmatmul.mubr.msk.f32.gmra.mrb[14].mxu0 %vm1098_vm1, %v425_v58 }
 0x24d   :  { %5021 = vmatprep.mubr.msk.f32.mxu0 %vm1098_vm1, %v426_v59 }
 0x250   :  { %5022 = vmatmul.mubr.msk.f32.gmra.mrb[16].mxu0 %vm1098_vm1, %v427_v60 }
 0x251   :  { %5024 = vmatprep.mubr.msk.f32.mxu0 %vm1098_vm1, %v428_v61 }
 0x254   :  { %5025 = vmatmul.mubr.msk.f32.gmra.mrb[18].mxu0 %vm1098_vm1, %v429_v47 }
 0x31b   :  { %v5017_v63 = vpop.f32.mrb[12].mxu0 }
 0x31c   :  { %v1253_v45 = vmul.f32 0.35355338, %v5017_v63  ;;  %v1213_v1 = vpop.f32.mrb[13].mxu0 }
 0x31d   :  { %v1252_v48 = vmul.f32 0.35355338, %v1213_v1 }
 0x31e   :  { %v1261_v3 = vadd.f32 %v1253_v45, %v40_v0 }
 0x31f   :  { %v5020_v4 = vpop.f32.mrb[14].mxu0  ;;  %v1260_v5 = vadd.f32 %v1252_v48, %v39_v2 }
 0x320   :  { %v1255_v6 = vmul.f32 0.35355338, %v5020_v4  ;;  %v1223_v7 = vpop.f32.mrb[15].mxu0  ;;  %v1272_v8 = vsel %vm1268_vm3, %v1261_v3, -inf }
 0x321   :  { %v1254_v10 = vmul.f32 0.35355338, %v1223_v7  ;;  %1273 = vmax.xlane.f32.xlu1 %v1272_v8  ;;  %v1269_v11 = vsel %vm1268_vm3, %v1260_v5, -inf }
 0x322   :  { %1270 = vmax.xlane.f32.xlu0 %v1269_v11  ;;  %v1263_v12 = vadd.f32 %v1255_v6, %v42_v46 }
 0x323   :  { %v5023_v13 = vpop.f32.mrb[16].mxu0  ;;  %v1262_v14 = vadd.f32 %v1254_v10, %v41_v9 }
 0x324   :  { %v1257_v16 = vmul.f32 0.35355338, %v5023_v13  ;;  %v1233_v17 = vpop.f32.mrb[17].mxu0  ;;  %v1278_v18 = vsel %vm1268_vm3, %v1263_v12, -inf }
 0x325   :  { %v1256_v20 = vmul.f32 0.35355338, %v1233_v17  ;;  %1279 = vmax.xlane.f32.xlu1 %v1278_v18  ;;  %v1275_v21 = vsel %vm1268_vm3, %v1262_v14, -inf }
 0x326   :  { %1276 = vmax.xlane.f32.xlu0 %v1275_v21  ;;  %v1265_v22 = vadd.f32 %v1257_v16, %v44_v15  ;;  %v1486_v15 = vld [vmem:[%s6881_s4] sm:$0xff] }
 0x327   :  { %v5026_v23 = vpop.f32.mrb[18].mxu0  ;;  %v1264_v24 = vadd.f32 %v1256_v20, %v43_v19  ;;  %5055 = vmatprep.subr.mxu1 %v1486_v15 }
 0x328   :  { %v1259_v26 = vmul.f32 0.35355338, %v5026_v23  ;;  %v1243_v27 = vpop.f32.mrb[19].mxu0  ;;  %v1284_v28 = vsel %vm1268_vm3, %v1265_v22, -inf }
 0x329   :  { %v1258_v30 = vmul.f32 0.35355338, %v1243_v27  ;;  %1285 = vmax.xlane.f32.xlu1 %v1284_v28  ;;  %v1281_v31 = vsel %vm1268_vm3, %v1264_v24, -inf }
 0x32a   :  { %1282 = vmax.xlane.f32.xlu0 %v1281_v31  ;;  %v1267_v32 = vadd.f32 %v1259_v26, %v46_v25 }
 0x32b   :  { %v1266_v33 = vadd.f32 %v1258_v30, %v45_v29 }
 0x32c   :  { %v1290_v34 = vsel %vm1268_vm3, %v1267_v32, -inf }
 0x32d   :  { %1291 = vmax.xlane.f32.xlu1 %v1290_v34  ;;  %v1287_v35 = vsel %vm1268_vm3, %v1266_v33, -inf }
 0x32e   :  { %1288 = vmax.xlane.f32.xlu0 %v1287_v35 }
 0x3ae   :  { %v1274_v36 = vpop.xlane.xlu1 %1273 }
 0x3af   :  { %v1294_v37 = vsub.f32 %v1261_v3, %v1274_v36  ;;  %v1271_v38 = vpop.xlane.xlu0 %1270 }
 0x3b0   :  { %v1293_v41 = vsub.f32 %v1260_v5, %v1271_v38 }
 0x3b1   :  { %v1303_v43 = vmul.f32 1.442695, %v1294_v37 }
 0x3b2   :  { %v1301_v49 = vmul.f32 1.442695, %v1293_v41  ;;  %v1280_v50 = vpop.xlane.xlu1 %1279 }
 0x3b3   :  { %5698 = vpow2.f32 %v1303_v43  ;;  %v1296_v52 = vsub.f32 %v1263_v12, %v1280_v50  ;;  %v1277_v53 = vpop.xlane.xlu0 %1276  ;;  %v1487_v43 = vld [vmem:[%s6881_s4 + $0x8] sm:$0xff] }
 0x3b4   :  { %5700 = vpow2.f32 %v1301_v49  ;;  %v1295_v54 = vsub.f32 %v1262_v14, %v1277_v53 }
 0x3b5   :  { %v1307_v55 = vmul.f32 1.442695, %v1296_v52  ;;  %v1488_v52 = vld [vmem:[%s6881_s4 + $0x10] sm:$0xff] }
 0x3b6   :  { %v1305_v56 = vmul.f32 1.442695, %v1295_v54  ;;  %v1286_v57 = vpop.xlane.xlu1 %1285 }
 0x3b7   :  { %5702 = vpow2.f32 %v1307_v55  ;;  %v1298_v58 = vsub.f32 %v1265_v22, %v1286_v57  ;;  %v1283_v39 = vpop.xlane.xlu0 %1282  ;;  %v1489_v55 = vld [vmem:[%s6881_s4 + $0x18] sm:$0xff] }
 0x3b8   :  { %5704 = vpow2.f32 %v1305_v56  ;;  %v1297_v59 = vsub.f32 %v1264_v24, %v1283_v39 }
 0x3b9   :  { %v1311_v42 = vmul.f32 1.442695, %v1298_v58 }
 0x3ba   :  { %v1309_v60 = vmul.f32 1.442695, %v1297_v59  ;;  %v1292_v40 = vpop.xlane.xlu1 %1291 }
 0x3bb   :  { %5706 = vpow2.f32 %v1311_v42  ;;  %v1300_v61 = vsub.f32 %v1267_v32, %v1292_v40  ;;  %v1289_v47 = vpop.xlane.xlu0 %1288  ;;  %v1828_v42 = vlaneseq }
 0x3bc   :  { %5708 = vpow2.f32 %v1309_v60  ;;  %v1299_v63 = vsub.f32 %v1266_v33, %v1289_v47 }
 0x3bd   :  { %v5699_v0 = vpop.eup %5698  ;;  %v1315_v45 = vmul.f32 1.442695, %v1300_v61  ;;  %v6288_v61 = vshrl.u32 %v1828_v42, 7 }
 0x3be   :  { %v5701_v1 = vpop.eup %5700  ;;  %v1313_v2 = vmul.f32 1.442695, %v1299_v63  ;;  %v1320_v48 = vsel %vm1268_vm3, %v5699_v0, 0.0 }
 0x3bf   :  { %5710 = vpow2.f32 %v1315_v45  ;;  %1321 = vadd.xlane.f32.xlu1 %v1320_v48  ;;  %v1317_v3 = vsel %vm1268_vm3, %v5701_v1, 0.0 }
 0x3c0   :  { %5712 = vpow2.f32 %v1313_v2  ;;  %1318 = vadd.xlane.f32.xlu0 %v1317_v3 }
 0x3c1   :  { %v5703_v4 = vpop.eup %5702 }
 0x3c2   :  { %v5705_v5 = vpop.eup %5704  ;;  %v1326_v46 = vsel %vm1268_vm3, %v5703_v4, 0.0 }
 0x3c3   :  { %1327 = vadd.xlane.f32.xlu1 %v1326_v46  ;;  %v1323_v6 = vsel %vm1268_vm3, %v5705_v5, 0.0 }
 0x3c4   :  { %1324 = vadd.xlane.f32.xlu0 %v1323_v6  ;;  %v6299_v6 = vld [vmem:[%s6885_s8] sm:$0x3f] }
 0x3c5   :  { %v5707_v7 = vpop.eup %5706 }
 0x3c6   :  { %v5709_v8 = vpop.eup %5708  ;;  %v1332_v9 = vsel %vm1268_vm3, %v5707_v7, 0.0 }
 0x3c7   :  { %1333 = vadd.xlane.f32.xlu1 %v1332_v9  ;;  %v1329_v10 = vsel %vm1268_vm3, %v5709_v8, 0.0 }
 0x3c8   :  { %1330 = vadd.xlane.f32.xlu0 %v1329_v10 }
 0x3c9   :  { %v5711_v11 = vpop.eup %5710 }
 0x3ca   :  { %v5713_v12 = vpop.eup %5712  ;;  %v1338_v13 = vsel %vm1268_vm3, %v5711_v11, 0.0 }
 0x3cb   :  { %1339 = vadd.xlane.f32.xlu1 %v1338_v13  ;;  %v1335_v14 = vsel %vm1268_vm3, %v5713_v12, 0.0 }
 0x3cc   :  { %1336 = vadd.xlane.f32.xlu0 %v1335_v14 }
 0x44c   :  { %v1322_v16 = vpop.xlane.xlu1 %1321 }
 0x44d   :  { %5714 = vrcp.f32 %v1322_v16  ;;  %v1319_v17 = vpop.xlane.xlu0 %1318 }
 0x44e   :  { %5716 = vrcp.f32 %v1319_v17 }
 0x450   :  { %v1328_v18 = vpop.xlane.xlu1 %1327 }
 0x451   :  { %5718 = vrcp.f32 %v1328_v18  ;;  %v1325_v19 = vpop.xlane.xlu0 %1324 }
 0x452   :  { %5720 = vrcp.f32 %v1325_v19 }
 0x454   :  { %v1334_v20 = vpop.xlane.xlu1 %1333 }
 0x455   :  { %5722 = vrcp.f32 %v1334_v20  ;;  %v1331_v21 = vpop.xlane.xlu0 %1330 }
 0x456   :  { %5724 = vrcp.f32 %v1331_v21 }
 0x457   :  { %v5715_v22 = vpop.eup %5714 }
 0x458   :  { %v5717_v23 = vpop.eup %5716  ;;  %v1340_v24 = vpop.xlane.xlu1 %1339  ;;  %v1350_v27 = vmul.f32 %v5715_v22, %v5699_v0 }
 0x459   :  { %5726 = vrcp.f32 %v1340_v24  ;;  %v1337_v25 = vpop.xlane.xlu0 %1336  ;;  %v1349_v26 = vmul.f32 %v5717_v23, %v5701_v1 }
 0x45a   :  { %5728 = vrcp.f32 %v1337_v25 }
 0x45b   :  { %v5719_v28 = vpop.eup %5718  ;;  %5043 = vmatprep.mubr.msk.f32.mxu1 %vm1268_vm3, %v1349_v26 }
 0x45c   :  { %v5721_v29 = vpop.eup %5720  ;;  %5044 = vmatmul.mubr.msk.f32.vlgmr.msra.gmra.mrb[12].mxu1 %vm1268_vm3, %v1350_v27  ;;  %v1352_v31 = vmul.f32 %v5719_v28, %v5703_v4  ;;  %v1830_v4 = vsub.s32 0, %v6288_v61 }
 0x45d   :  { %v1351_v30 = vmul.f32 %v5721_v29, %v5705_v5  ;;  %5056 = vmatpush3.msra.mxu1 %v1486_v15 }
 0x45e   :  { %5060 = vmatprep.subr.mxu1 %v1487_v43 }
 0x45f   :  { %v5723_v32 = vpop.eup %5722  ;;  %5046 = vmatprep.mubr.msk.f32.mxu1 %vm1268_vm3, %v1351_v30 }
 0x460   :  { %v5725_v33 = vpop.eup %5724  ;;  %5047 = vmatmul.mubr.msk.f32.gmra.mrb[14].mxu1 %vm1268_vm3, %v1352_v31  ;;  %v1354_v35 = vmul.f32 %v5723_v32, %v5707_v7  ;;  %v1875_v32 = vld [vmem:[%s6882_s5 + $0x8] sm:$0xff] }
 0x461   :  { %v1353_v34 = vmul.f32 %v5725_v33, %v5709_v8 }
 0x463   :  { %v5727_v36 = vpop.eup %5726  ;;  %5049 = vmatprep.mubr.msk.f32.mxu1 %vm1268_vm3, %v1353_v34  ;;  %v1876_v34 = vld [vmem:[%s6882_s5 + $0x10] sm:$0xff] }
 0x464   :  { %v5729_v37 = vpop.eup %5728  ;;  %5050 = vmatmul.mubr.msk.f32.gmra.mrb[16].mxu1 %vm1268_vm3, %v1354_v35  ;;  %v1356_v41 = vmul.f32 %v5727_v36, %v5711_v11  ;;  %v1831_v11 = vrot.slane %v6299_v6, %v1830_v4  ;;  %v1877_v35 = vld [vmem:[%s6882_s5 + $0x18] sm:$0xff] }
 0x465   :  { %v1355_v38 = vmul.f32 %v5729_v37, %v5713_v12  ;;  %v5501_v36 = vpack.c.bf16 %v1877_v35, %v1876_v34 }
 0x467   :  { %5052 = vmatprep.mubr.msk.f32.mxu1 %vm1268_vm3, %v1355_v38 }
 0x468   :  { %5053 = vmatmul.mubr.msk.f32.gmra.mrb[18].mxu1 %vm1268_vm3, %v1356_v41 }
 0x52f   :  { %v5045_v49 = vpop.f32.mrb[12].mxu1 }
 0x530   :  { %v1447_v50 = vpop.f32.mrb[13].mxu1 }
 0x531   :  { %5057 = vmatprep.mubr.msk.f32.mxu1 %vm1098_vm1, %v1447_v50 }
 0x532   :  { %5058 = vmatmul.mubr.msk.f32.vlgmr.msra.gmra.mrb[20].mxu1 %vm1098_vm1, %v5045_v49 }
 0x533   :  { %v5048_v53 = vpop.f32.mrb[14].mxu1  ;;  %5061 = vmatpush3.msra.mxu1 %v1487_v43 }
 0x534   :  { %v1457_v54 = vpop.f32.mrb[15].mxu1  ;;  %5065 = vmatprep.subr.mxu1 %v1488_v52 }
 0x535   :  { %5062 = vmatprep.mubr.msk.f32.mxu1 %vm1098_vm1, %v1457_v54 }
 0x536   :  { %5063 = vmatmul.mubr.msk.f32.vlgmr.msra.gmra.mrb[22].mxu1 %vm1098_vm1, %v5048_v53  ;;  %v1870_v53 = vsub.s32 2, %v6288_v61 }
 0x537   :  { %v5051_v56 = vpop.f32.mrb[16].mxu1  ;;  %5066 = vmatpush3.msra.mxu1 %v1488_v52  ;;  %v1864_v52 = vsub.s32 1, %v6288_v61 }
 0x538   :  { %v1467_v57 = vpop.f32.mrb[17].mxu1  ;;  %5070 = vmatprep.subr.mxu1 %v1489_v55 }
 0x539   :  { %5067 = vmatprep.mubr.msk.f32.mxu1 %vm1098_vm1, %v1467_v57  ;;  %v1865_v54 = vrot.slane %v6299_v6, %v1864_v52 }
 0x53a   :  { %5068 = vmatmul.mubr.msk.f32.vlgmr.msra.gmra.mrb[24].mxu1 %vm1098_vm1, %v5051_v56 }
 0x53b   :  { %v5054_v58 = vpop.f32.mrb[18].mxu1  ;;  %5071 = vmatpush3.msra.mxu1 %v1489_v55 }
 0x53c   :  { %v1477_v39 = vpop.f32.mrb[19].mxu1 }
 0x53d   :  { %5072 = vmatprep.mubr.msk.f32.mxu1 %vm1098_vm1, %v1477_v39  ;;  %v1871_v39 = vrot.slane %v6299_v6, %v1870_v53 }
 0x53e   :  { %5073 = vmatmul.mubr.msk.f32.vlgmr.msra.gmra.mrb[26].mxu1 %vm1098_vm1, %v5054_v58 }
 0x605   :  { %v5059_v59 = vpop.f32.mrb[20].mxu1 }
 0x606   :  { %v1562_v60 = vpop.f32.mrb[21].mxu1  ;;  %v1821_v47 = vsel %vm51_vm0, %v5059_v59, 0.0 }
 0x607   :  { %v1814_v45 = vsel %vm51_vm0, %v1562_v60, 0.0 }
 0x609   :  { %v5064_v40 = vpop.f32.mrb[22].mxu1 }
 0x60a   :  { %v1822_v63 = vsel %vm51_vm0, %v5064_v40, 0.0  ;;  %v1643_v0 = vpop.f32.mrb[23].mxu1 }
 0x60b   :  { %v1823_v1 = vadd.f32 %v1822_v63, %v1821_v47  ;;  %v1815_v2 = vsel %vm51_vm0, %v1643_v0, 0.0  ;;  %v1984_v63 = vld [vmem:[%s6884_s7] sm:$0xff]  ;;  %v1985_v0 = vld [vmem:[%s6884_s7 + $0x8] sm:$0xff] }
 0x60c   :  { %v1816_v48 = vadd.f32 %v1815_v2, %v1814_v45  ;;  %v1986_v45 = vld [vmem:[%s6884_s7 + $0x10] sm:$0xff]  ;;  %v1987_v2 = vld [vmem:[%s6884_s7 + $0x18] sm:$0xff] }
 0x60d   :  { %v5069_v3 = vpop.f32.mrb[24].mxu1 }
 0x60e   :  { %v1824_v5 = vsel %vm51_vm0, %v5069_v3, 0.0  ;;  %v1724_v46 = vpop.f32.mrb[25].mxu1  ;;  %v1988_v3 = vld [vmem:[%s6884_s7 + $0x20] sm:$0xff] }
 0x60f   :  { %v1825_v7 = vadd.f32 %v1824_v5, %v1823_v1  ;;  %v1817_v8 = vsel %vm51_vm0, %v1724_v46, 0.0  ;;  %v5505_v1 = vpack.c.bf16 %v1985_v0, %v1984_v63  ;;  %v1989_v5 = vld [vmem:[%s6884_s7 + $0x28] sm:$0xff]  ;;  %v4449_v63 = vld [vmem:[%s6879_s2 + $0x1c0] sm:$0xff] }
 0x610   :  { %v1818_v9 = vadd.f32 %v1817_v8, %v1816_v48  ;;  %v5509_v48 = vpack.c.bf16 %v1987_v2, %v1986_v45  ;;  %v5513_v46 = vpack.c.bf16 %v1989_v5, %v1988_v3  ;;  %v1991_v8 = vld [vmem:[%s6884_s7 + $0x38] sm:$0xff]  ;;  %v4450_v45 = vld [vmem:[%s6879_s2 + $0x1c8] sm:$0xff]  ;;  %v4443_v2 = vld [vmem:[%s6879_s2 + $0x190] sm:$0xff] }
 0x611   :  { %v5074_v10 = vpop.f32.mrb[26].mxu1  ;;  %5506 = vmatprep.subr.bf16.mxu1 %v5505_v1  ;;  %v4451_v3 = vld [vmem:[%s6879_s2 + $0x1d0] sm:$0xff] }
 0x612   :  { %v1826_v12 = vsel %vm51_vm0, %v5074_v10, 0.0  ;;  %v1805_v13 = vpop.f32.mrb[27].mxu1  ;;  %5508 = vmatpush3.bf16.msra.mxu1 %v5505_v1  ;;  %v4435_v10 = vld [vmem:[%s6883_s6] ss:$0 sm:$0xff]  ;;  %v5537_v1 = vpack.c.bf16 %v4450_v45, %v4449_v63  ;;  %v4480_v45 = vld [vmem:[%s6879_s2 + $0x238] sm:$0xff] }
 0x613   :  { %v1827_v14 = vadd.f32 %v1826_v12, %v1825_v7  ;;  %v1819_v15 = vsel %vm51_vm0, %v1805_v13, 0.0  ;;  %5510 = vmatprep.subr.bf16.mxu1 %v5509_v48  ;;  %v1990_v7 = vld [vmem:[%s6884_s7 + $0x30] sm:$0xff] }
 0x614   :  { %v1820_v16 = vadd.f32 %v1819_v15, %v1818_v9  ;;  %v5517_v9 = vpack.c.bf16 %v1991_v8, %v1990_v7  ;;  %v4445_v8 = vld [vmem:[%s6879_s2 + $0x1a0] sm:$0xff] }
 0x615   :  { %v1833_v17 = vadd.f32 %v1831_v11, %v1827_v14 }
 0x616   :  { %v1832_v18 = vadd.f32 %v1831_v11, %v1820_v16  ;;  %5512 = vmatpush3.bf16.msra.mxu1 %v5509_v48  ;;  %v4444_v48 = vld [vmem:[%s6879_s2 + $0x198] sm:$0xff] }
 0x617   :  { %v1835_v19 = vadd.f32 %v1833_v17, %v5954_v51  ;;  %5514 = vmatprep.subr.bf16.mxu1 %v5513_v46  ;;  %v5525_v5 = vpack.c.bf16 %v4444_v48, %v4443_v2  ;;  %v4508_v2 = vld [vmem:[%s6879_s2 + $0x298] sm:$0xff] }
 0x618   :  { %v1834_v20 = vadd.f32 %v1832_v18, %v5936_v44  ;;  %v1874_v44 = vld [vmem:[%s6882_s5] sm:$0xff] }
 0x619   :  { %v1839_v21 = vsel %vm51_vm0, %v1835_v19, 0.0  ;;  %v5497_v33 = vpack.c.bf16 %v1875_v32, %v1874_v44  ;;  %v1994_v44 = vsub.s32 3, %v6288_v61 }
 0x61a   :  { %1840 = vadd.xlane.f32.xlu1 %v1839_v21  ;;  %v1836_v22 = vsel %vm51_vm0, %v1834_v20, 0.0  ;;  %5516 = vmatpush3.bf16.msra.mxu1 %v5513_v46  ;;  %v4452_v46 = vld [vmem:[%s6879_s2 + $0x1d8] sm:$0xff] }
 0x61b   :  { %1837 = vadd.xlane.f32.xlu0 %v1836_v22  ;;  %5498 = vmatprep.subr.bf16.mxu0 %v5497_v33  ;;  %v1995_v32 = vrot.slane %v6299_v6, %v1994_v44  ;;  %v5541_v7 = vpack.c.bf16 %v4452_v46, %v4451_v3  ;;  %v4485_v3 = vld [vmem:[%s6879_s2 + $0x260] sm:$0xff] }
 0x61c   :  { %5500 = vmatpush3.bf16.msra.mxu0 %v5497_v33  ;;  %5518 = vmatprep.subr.bf16.mxu1 %v5517_v9 }
 0x61d   :  { %5502 = vmatprep.subr.bf16.mxu0 %v5501_v36 }
 0x61e   :  { %5520 = vmatpush3.bf16.msra.mxu1 %v5517_v9  ;;  %v4446_v9 = vld [vmem:[%s6879_s2 + $0x1a8] sm:$0xff] }
 0x61f   :  { %5538 = vmatprep.subr.bf16.mxu1 %v5537_v1 }
 0x620   :  { %5504 = vmatpush3.bf16.msra.mxu0 %v5501_v36 }
 0x6a7   :  { %v1841_v23 = vpop.xlane.xlu1 %1840 }
 0x6a8   :  { %v1843_v24 = vmul.f32 0.03125, %v1841_v23  ;;  %v1838_v25 = vpop.xlane.xlu0 %1837 }
 0x6a9   :  { %v1842_v26 = vmul.f32 0.03125, %v1838_v25 }
 0x6aa   :  { %v1845_v27 = vsub.f32 %v1835_v19, %v1843_v24 }
 0x6ab   :  { %v1844_v28 = vsub.f32 %v1834_v20, %v1842_v26 }
 0x6ac   :  { %v1847_v29 = vmul.f32 %v1845_v27, %v1845_v27 }
 0x6ad   :  { %v1846_v30 = vmul.f32 %v1844_v28, %v1844_v28 }
 0x6ae   :  { %v1851_v31 = vsel %vm51_vm0, %v1847_v29, 0.0 }
 0x6af   :  { %1852 = vadd.xlane.f32.xlu1 %v1851_v31  ;;  %v1848_v51 = vsel %vm51_vm0, %v1846_v30, 0.0 }
 0x6b0   :  { %1849 = vadd.xlane.f32.xlu0 %v1848_v51 }
 0x73c   :  { %v1853_v37 = vpop.xlane.xlu1 %1852 }
 0x73d   :  { %v1855_v38 = vmul.f32 0.03125, %v1853_v37  ;;  %v1850_v41 = vpop.xlane.xlu0 %1849 }
 0x73e   :  { %v1854_v43 = vmul.f32 0.03125, %v1850_v41 }
 0x73f   :  { %v1857_v49 = vadd.f32 1e-12, %v1855_v38 }
 0x740   :  { %v1856_v50 = vadd.f32 1e-12, %v1854_v43 }
 0x741   :  { %5730 = vrsqrt.f32 %v1857_v49 }
 0x742   :  { %5732 = vrsqrt.f32 %v1856_v50 }
 0x74b   :  { %v5731_v55 = vpop.eup %5730 }
 0x74c   :  { %v5733_v56 = vpop.eup %5732  ;;  %v1861_v57 = vmul.f32 %v5731_v55, %v1845_v27 }
 0x74d   :  { %v1860_v58 = vmul.f32 %v5733_v56, %v1844_v28 }
 0x74e   :  { %v1867_v59 = vmul.f32 %v1865_v54, %v1861_v57 }
 0x74f   :  { %v1866_v60 = vmul.f32 %v1865_v54, %v1860_v58 }
 0x750   :  { %v1873_v47 = vadd.f32 %v1871_v39, %v1867_v59 }
 0x751   :  { %v1872_v40 = vadd.f32 %v1871_v39, %v1866_v60 }
 0x753   :  { %5083 = vmatprep.mubr.msk.f32.mxu0 %vm51_vm0, %v1872_v40 }
 0x754   :  { %5084 = vmatmul.mubr.msk.f32.vlgmr.msra.gmra.mrb[20].mxu0 %vm51_vm0, %v1873_v47 }
 0x827   :  { %v5085_v11 = vpop.f32.mrb[20].mxu0 }
 0x828   :  { %v1963_v12 = vadd.f32 %v5085_v11, %v4435_v10  ;;  %v1957_v13 = vpop.f32.mrb[21].mxu0  ;;  %v5529_v11 = vpack.c.bf16 %v4446_v9, %v4445_v8  ;;  %v4514_v8 = vld [vmem:[%s6879_s2 + $0x2c8] sm:$0xff] }
 0x829   :  { %v1958_v14 = vadd.f32 %v4435_v10, %v1957_v13  ;;  %v4473_v10 = vld [vmem:[%s6879_s2 + $0x200] sm:$0xff] }
 0x82a   :  { %v1969_v15 = vmul.f32 0.044715, %v1963_v12  ;;  %v1967_v30 = vmul.f32 0.5, %v1963_v12 }
 0x82b   :  { %v1968_v16 = vmul.f32 0.044715, %v1958_v14  ;;  %v1966_v28 = vmul.f32 0.5, %v1958_v14 }
 0x82c   :  { %v1971_v17 = vmul.f32 %v1969_v15, %v1963_v12 }
 0x82d   :  { %v1970_v18 = vmul.f32 %v1968_v16, %v1958_v14 }
 0x82e   :  { %v1973_v19 = vmul.f32 %v1971_v17, %v1963_v12 }
 0x82f   :  { %v1972_v20 = vmul.f32 %v1970_v18, %v1958_v14 }
 0x830   :  { %v1975_v21 = vadd.f32 %v1973_v19, %v1963_v12  ;;  %v4474_v12 = vld [vmem:[%s6879_s2 + $0x208] sm:$0xff] }
 0x831   :  { %v1974_v22 = vadd.f32 %v1972_v20, %v1958_v14  ;;  %v5553_v13 = vpack.c.bf16 %v4474_v12, %v4473_v10  ;;  %v2107_v20 = vsub.s32 4, %v6288_v61  ;;  %v4488_v12 = vld [vmem:[%s6879_s2 + $0x278] sm:$0xff] }
 0x832   :  { %v1977_v23 = vmul.f32 0.7978846, %v1975_v21  ;;  %v2113_v21 = vsub.s32 5, %v6288_v61 }
 0x833   :  { %v1976_v24 = vmul.f32 0.7978846, %v1974_v22  ;;  %v2108_v22 = vrot.slane %v6299_v6, %v2107_v20 }
 0x834   :  { %5734 = vtanh.f32 %v1977_v23 }
 0x835   :  { %5736 = vtanh.f32 %v1976_v24 }
 0x83e   :  { %v5735_v25 = vpop.eup %5734 }
 0x83f   :  { %v5737_v26 = vpop.eup %5736  ;;  %v1981_v27 = vadd.f32 1.0, %v5735_v25 }
 0x840   :  { %v1980_v29 = vadd.f32 1.0, %v5737_v26  ;;  %v2114_v26 = vrot.slane %v6299_v6, %v2113_v21 }
 0x841   :  { %v1983_v51 = vmul.f32 %v1981_v27, %v1967_v30  ;;  %v4447_v30 = vld [vmem:[%s6879_s2 + $0x1b0] sm:$0xff] }
 0x842   :  { %v1982_v31 = vmul.f32 %v1980_v29, %v1966_v28 }
 0x844   :  { %5102 = vmatprep.mubr.msk.f32.mxu1 %vm1268_vm3, %v1982_v31  ;;  %v4448_v31 = vld [vmem:[%s6879_s2 + $0x1b8] sm:$0xff] }
 0x845   :  { %5103 = vmatmul.mubr.msk.f32.vlgmr.msra.gmra.mrb[28].mxu1 %vm1268_vm3, %v1983_v51  ;;  %v4475_v51 = vld [vmem:[%s6879_s2 + $0x210] sm:$0xff] }
 0x846   :  { %5540 = vmatpush3.bf16.msra.mxu1 %v5537_v1  ;;  %v4507_v1 = vld [vmem:[%s6879_s2 + $0x290] sm:$0xff] }
 0x847   :  { %5542 = vmatprep.subr.bf16.mxu1 %v5541_v7  ;;  %v5589_v46 = vpack.c.bf16 %v4508_v2, %v4507_v1  ;;  %v4530_v1 = vld [vmem:[%s6880_s3 + $0x148] sm:$0xff]  ;;  %v4499_v2 = vld [vmem:[%s6880_s3 + $0x110] sm:$0xff] }
 0x84a   :  { %5544 = vmatpush3.bf16.msra.mxu1 %v5541_v7  ;;  %v4513_v7 = vld [vmem:[%s6879_s2 + $0x2c0] sm:$0xff] }
 0x84b   :  { %5554 = vmatprep.subr.bf16.mxu1 %v5553_v13  ;;  %v5601_v10 = vpack.c.bf16 %v4514_v8, %v4513_v7 }
 0x918   :  { %v5104_v33 = vpop.f32.mrb[28].mxu1 }
 0x919   :  { %v2074_v34 = vadd.f32 %v5104_v33, %v1995_v32  ;;  %v2068_v35 = vpop.f32.mrb[29].mxu1 }
 0x91a   :  { %v2069_v36 = vadd.f32 %v2068_v35, %v1995_v32  ;;  %v4476_v32 = vld [vmem:[%s6879_s2 + $0x218] sm:$0xff]  ;;  %v5533_v35 = vpack.c.bf16 %v4448_v31, %v4447_v30  ;;  %v4465_v31 = vld [vmem:[%s6880_s3 + $0xc0] sm:$0xff] }
 0x91b   :  { %v2078_v37 = vadd.f32 %v2074_v34, %v1873_v47  ;;  %v4442_v47 = vld [vmem:[%s6879_s2 + $0x188] sm:$0xff]  ;;  %v4453_v34 = vld [vmem:[%s6879_s2 + $0x1e0] sm:$0xff] }
 0x91c   :  { %v2077_v38 = vadd.f32 %v2069_v36, %v1872_v40  ;;  %v4441_v40 = vld [vmem:[%s6879_s2 + $0x180] sm:$0xff]  ;;  %v5557_v36 = vpack.c.bf16 %v4476_v32, %v4475_v51 }
 0x91d   :  { %v2082_v41 = vsel %vm51_vm0, %v2078_v37, 0.0  ;;  %v5521_v0 = vpack.c.bf16 %v4442_v47, %v4441_v40  ;;  %v4506_v40 = vld [vmem:[%s6879_s2 + $0x288] sm:$0xff] }
 0x91e   :  { %2083 = vadd.xlane.f32.xlu1 %v2082_v41  ;;  %v2079_v43 = vsel %vm51_vm0, %v2077_v38, 0.0  ;;  %v4482_v41 = vld [vmem:[%s6879_s2 + $0x248] sm:$0xff] }
 0x91f   :  { %2080 = vadd.xlane.f32.xlu0 %v2079_v43  ;;  %5522 = vmatprep.subr.bf16.mxu0 %v5521_v0 }
 0x920   :  { %5524 = vmatpush3.bf16.msra.mxu0 %v5521_v0  ;;  %v4479_v0 = vld [vmem:[%s6879_s2 + $0x230] sm:$0xff] }
 0x921   :  { %5526 = vmatprep.subr.bf16.mxu0 %v5525_v5  ;;  %v5565_v48 = vpack.c.bf16 %v4480_v45, %v4479_v0  ;;  %v4500_v45 = vld [vmem:[%s6880_s3 + $0x118] sm:$0xff] }
 0x924   :  { %5528 = vmatpush3.bf16.msra.mxu0 %v5525_v5  ;;  %v4486_v5 = vld [vmem:[%s6879_s2 + $0x268] sm:$0xff] }
 0x925   :  { %5530 = vmatprep.subr.bf16.mxu0 %v5529_v11  ;;  %v5577_v9 = vpack.c.bf16 %v4486_v5, %v4485_v3  ;;  %v4529_v3 = vld [vmem:[%s6880_s3 + $0x140] sm:$0xff] }
 0x9ab   :  { %v2084_v49 = vpop.xlane.xlu1 %2083 }
 0x9ac   :  { %v2086_v50 = vmul.f32 0.03125, %v2084_v49  ;;  %v2081_v54 = vpop.xlane.xlu0 %2080 }
 0x9ad   :  { %v2085_v55 = vmul.f32 0.03125, %v2081_v54  ;;  %v4456_v54 = vld [vmem:[%s6879_s2 + $0x1f8] sm:$0xff] }
 0x9ae   :  { %v2088_v56 = vsub.f32 %v2078_v37, %v2086_v50  ;;  %v4454_v37 = vld [vmem:[%s6879_s2 + $0x1e8] sm:$0xff]  ;;  %v4455_v50 = vld [vmem:[%s6879_s2 + $0x1f0] sm:$0xff] }
 0x9af   :  { %v2087_v57 = vsub.f32 %v2077_v38, %v2085_v55  ;;  %v4481_v38 = vld [vmem:[%s6879_s2 + $0x240] sm:$0xff]  ;;  %v5545_v43 = vpack.c.bf16 %v4454_v37, %v4453_v34  ;;  %v4483_v55 = vld [vmem:[%s6879_s2 + $0x250] sm:$0xff]  ;;  %v4498_v37 = vld [vmem:[%s6880_s3 + $0x108] sm:$0xff] }
 0x9b0   :  { %v2090_v58 = vmul.f32 %v2088_v56, %v2088_v56  ;;  %v5569_v49 = vpack.c.bf16 %v4482_v41, %v4481_v38  ;;  %v4497_v38 = vld [vmem:[%s6880_s3 + $0x100] sm:$0xff] }
 0x9b1   :  { %v2089_v39 = vmul.f32 %v2087_v57, %v2087_v57 }
 0x9b2   :  { %v2094_v59 = vsel %vm51_vm0, %v2090_v58, 0.0 }
 0x9b3   :  { %2095 = vadd.xlane.f32.xlu1 %v2094_v59  ;;  %v2091_v60 = vsel %vm51_vm0, %v2089_v39, 0.0  ;;  %v4477_v39 = vld [vmem:[%s6879_s2 + $0x220] sm:$0xff]  ;;  %v4478_v59 = vld [vmem:[%s6879_s2 + $0x228] sm:$0xff] }
 0x9b4   :  { %2092 = vadd.xlane.f32.xlu0 %v2091_v60  ;;  %v4505_v60 = vld [vmem:[%s6879_s2 + $0x280] sm:$0xff]  ;;  %v5561_v47 = vpack.c.bf16 %v4478_v59, %v4477_v39 }
 0x9b5   :  { %v5585_v63 = vpack.c.bf16 %v4506_v40, %v4505_v60  ;;  %v4501_v39 = vld [vmem:[%s6880_s3 + $0x120] sm:$0xff] }
 0xa40   :  { %v2096_v14 = vpop.xlane.xlu1 %2095 }
 0xa41   :  { %v2098_v15 = vmul.f32 0.03125, %v2096_v14  ;;  %v2093_v16 = vpop.xlane.xlu0 %2092  ;;  %v4516_v14 = vld [vmem:[%s6879_s2 + $0x2d8] sm:$0xff] }
 0xa42   :  { %v2097_v17 = vmul.f32 0.03125, %v2093_v16  ;;  %v4509_v16 = vld [vmem:[%s6879_s2 + $0x2a0] sm:$0xff] }
 0xa43   :  { %v2100_v18 = vadd.f32 1e-12, %v2098_v15 }
 0xa44   :  { %v2099_v19 = vadd.f32 1e-12, %v2097_v17  ;;  %v4510_v17 = vld [vmem:[%s6879_s2 + $0x2a8] sm:$0xff] }
 0xa45   :  { %5738 = vrsqrt.f32 %v2100_v18 }
 0xa46   :  { %5740 = vrsqrt.f32 %v2099_v19  ;;  %v5593_v19 = vpack.c.bf16 %v4510_v17, %v4509_v16  ;;  %v4503_v16 = vld [vmem:[%s6880_s3 + $0x130] sm:$0xff] }
 0xa4f   :  { %v5739_v23 = vpop.eup %5738 }
 0xa50   :  { %v5741_v24 = vpop.eup %5740  ;;  %v2104_v25 = vmul.f32 %v5739_v23, %v2088_v56  ;;  %v4484_v56 = vld [vmem:[%s6879_s2 + $0x258] sm:$0xff] }
 0xa51   :  { %v2103_v27 = vmul.f32 %v5741_v24, %v2087_v57  ;;  %v5549_v57 = vpack.c.bf16 %v4456_v54, %v4455_v50  ;;  %v5573_v58 = vpack.c.bf16 %v4484_v56, %v4483_v55  ;;  %v4512_v23 = vld [vmem:[%s6879_s2 + $0x2b8] sm:$0xff] }
 0xa52   :  { %v2110_v28 = vmul.f32 %v2108_v22, %v2104_v25  ;;  %v4517_v25 = vld [vmem:[%s6879_s2 + $0x2e0] sm:$0xff] }
 0xa53   :  { %v2109_v29 = vmul.f32 %v2108_v22, %v2103_v27  ;;  %v4511_v22 = vld [vmem:[%s6879_s2 + $0x2b0] sm:$0xff] }
 0xa54   :  { %v6430_v33 = vadd.f32 %v2114_v26, %v2110_v28  ;;  %v5597_v24 = vpack.c.bf16 %v4512_v23, %v4511_v22  ;;  %v4519_v28 = vld [vmem:[%s6879_s2 + $0x2f0] sm:$0xff] }
 0xa55   :  { %v6428_v6 = vadd.f32 %v2114_v26, %v2109_v29  ;;  %v4518_v26 = vld [vmem:[%s6879_s2 + $0x2e8] sm:$0xff]  ;;  %v4520_v29 = vld [vmem:[%s6879_s2 + $0x2f8] sm:$0xff] }
 0xa56   :  { %v5609_v27 = vpack.c.bf16 %v4518_v26, %v4517_v25  ;;  %v5613_v30 = vpack.c.bf16 %v4520_v29, %v4519_v28 }
 0xa57   :  { %5113 = vmatprep.mubr.msk.f32.mxu0 %vm51_vm0, %v6428_v6  ;;  %5135 = vmatprep.mubr.msk.f32.mxu1 %vm51_vm0, %v6428_v6 }
 0xa58   :  { %5114 = vmatmul.mubr.msk.f32.vlgmr.msra.gmra.mrb[22].mxu0 %vm51_vm0, %v6430_v33  ;;  %5136 = vmatmul.mubr.msk.f32.vlgmr.msra.gmra.mrb[30].mxu1 %vm51_vm0, %v6430_v33 }
 0xa59   :  { %5532 = vmatpush3.bf16.msra.mxu0 %v5529_v11  ;;  %5556 = vmatpush3.bf16.msra.mxu1 %v5553_v13  ;;  %v4487_v11 = vld [vmem:[%s6879_s2 + $0x270] sm:$0xff] }
 0xa5a   :  { %5124 = vmatprep.mubr.msk.f32.mxu0 %vm51_vm0, %v6428_v6  ;;  %5157 = vmatprep.mubr.msk.f32.mxu1 %vm51_vm0, %v6428_v6  ;;  %v4515_v13 = vld [vmem:[%s6879_s2 + $0x2d0] sm:$0xff]  ;;  %v5581_v15 = vpack.c.bf16 %v4488_v12, %v4487_v11 }
 0xa5b   :  { %5534 = vmatprep.subr.bf16.mxu0 %v5533_v35  ;;  %5558 = vmatprep.subr.bf16.mxu1 %v5557_v36  ;;  %v5605_v18 = vpack.c.bf16 %v4516_v14, %v4515_v13  ;;  %v4504_v14 = vld [vmem:[%s6880_s3 + $0x138] sm:$0xff] }
 0xa5d   :  { %5536 = vmatpush3.bf16.msra.mxu0 %v5533_v35  ;;  %5560 = vmatpush3.bf16.msra.mxu1 %v5557_v36 }
 0xa5e   :  { %5546 = vmatprep.subr.bf16.mxu0 %v5545_v43  ;;  %5570 = vmatprep.subr.bf16.mxu1 %v5569_v49 }
 0xa60   :  { %5125 = vmatmul.mubr.msk.f32.vlgmr.msra.gmra.mrb[24].mxu0 %vm51_vm0, %v6430_v33  ;;  %5158 = vmatmul.mubr.msk.f32.vlgmr.msra.gmra.mrb[32].mxu1 %vm51_vm0, %v6430_v33 }
 0xa61   :  { %5548 = vmatpush3.bf16.msra.mxu0 %v5545_v43  ;;  %5146 = vmatprep.mubr.msk.f32.mxu0 %vm51_vm0, %v6428_v6 }
 0xa62   :  { %5572 = vmatpush3.bf16.msra.mxu1 %v5569_v49  ;;  %5179 = vmatprep.mubr.msk.f32.mxu1 %vm51_vm0, %v6428_v6 }
 0xa63   :  { %5550 = vmatprep.subr.bf16.mxu0 %v5549_v57  ;;  %5574 = vmatprep.subr.bf16.mxu1 %v5573_v58 }
 0xa65   :  { %5552 = vmatpush3.bf16.msra.mxu0 %v5549_v57  ;;  %v4502_v57 = vld [vmem:[%s6880_s3 + $0x128] sm:$0xff] }
 0xa66   :  { %5576 = vmatpush3.bf16.msra.mxu1 %v5573_v58  ;;  %5562 = vmatprep.subr.bf16.mxu0 %v5561_v47 }
 0xa67   :  { %5586 = vmatprep.subr.bf16.mxu1 %v5585_v63 }
 0xa68   :  { %5147 = vmatmul.mubr.msk.f32.vlgmr.msra.gmra.mrb[26].mxu0 %vm51_vm0, %v6430_v33 }
 0xa69   :  { %5180 = vmatmul.mubr.msk.f32.vlgmr.msra.gmra.mrb[34].mxu1 %vm51_vm0, %v6430_v33  ;;  %5564 = vmatpush3.bf16.msra.mxu0 %v5561_v47 }
 0xa6a   :  { %5168 = vmatprep.mubr.msk.f32.mxu0 %vm51_vm0, %v6428_v6  ;;  %5588 = vmatpush3.bf16.msra.mxu1 %v5585_v63 }
 0xa6b   :  { %5201 = vmatprep.mubr.msk.f32.mxu1 %vm51_vm0, %v6428_v6  ;;  %5566 = vmatprep.subr.bf16.mxu0 %v5565_v48 }
 0xa6c   :  { %5590 = vmatprep.subr.bf16.mxu1 %v5589_v46 }
 0xa6d   :  { %5568 = vmatpush3.bf16.msra.mxu0 %v5565_v48 }
 0xa6e   :  { %5592 = vmatpush3.bf16.msra.mxu1 %v5589_v46  ;;  %5578 = vmatprep.subr.bf16.mxu0 %v5577_v9 }
 0xa6f   :  { %5602 = vmatprep.subr.bf16.mxu1 %v5601_v10 }
 0xa70   :  { %5169 = vmatmul.mubr.msk.f32.vlgmr.msra.gmra.mrb[28].mxu0 %vm51_vm0, %v6430_v33 }
 0xa71   :  { %5202 = vmatmul.mubr.msk.f32.vlgmr.msra.gmra.mrb[36].mxu1 %vm51_vm0, %v6430_v33  ;;  %5580 = vmatpush3.bf16.msra.mxu0 %v5577_v9 }
 0xa72   :  { %5190 = vmatprep.mubr.msk.f32.mxu0 %vm51_vm0, %v6428_v6  ;;  %5604 = vmatpush3.bf16.msra.mxu1 %v5601_v10 }
 0xa73   :  { %5223 = vmatprep.mubr.msk.f32.mxu1 %vm51_vm0, %v6428_v6  ;;  %5582 = vmatprep.subr.bf16.mxu0 %v5581_v15 }
 0xa74   :  { %5606 = vmatprep.subr.bf16.mxu1 %v5605_v18 }
 0xa75   :  { %5584 = vmatpush3.bf16.msra.mxu0 %v5581_v15  ;;  %v4534_v15 = vld [vmem:[%s6880_s3 + $0x168] sm:$0xff] }
 0xa76   :  { %5608 = vmatpush3.bf16.msra.mxu1 %v5605_v18  ;;  %5594 = vmatprep.subr.bf16.mxu0 %v5593_v19  ;;  %v4533_v18 = vld [vmem:[%s6880_s3 + $0x160] sm:$0xff] }
 0xa78   :  { %5191 = vmatmul.mubr.msk.f32.vlgmr.msra.gmra.mrb[30].mxu0 %vm51_vm0, %v6430_v33 }
 0xa79   :  { %5224 = vmatmul.mubr.msk.f32.vlgmr.msra.gmra.mrb[38].mxu1 %vm51_vm0, %v6430_v33  ;;  %5596 = vmatpush3.bf16.msra.mxu0 %v5593_v19 }
 0xa7a   :  { %5212 = vmatprep.mubr.msk.f32.mxu0 %vm51_vm0, %v6428_v6  ;;  %5598 = vmatprep.subr.bf16.mxu0 %v5597_v24 }
 0xa7d   :  { %5600 = vmatpush3.bf16.msra.mxu0 %v5597_v24 }
 0xa7e   :  { %5610 = vmatprep.subr.bf16.mxu0 %v5609_v27 }
 0xa80   :  { %5213 = vmatmul.mubr.msk.f32.vlgmr.msra.gmra.mrb[32].mxu0 %vm51_vm0, %v6430_v33 }
 0xa81   :  { %5612 = vmatpush3.bf16.msra.mxu0 %v5609_v27  ;;  %5234 = vmatprep.mubr.msk.f32.mxu0 %vm51_vm0, %v6428_v6 }
 0xa82   :  { %5614 = vmatprep.subr.bf16.mxu0 %v5613_v30 }
 0xa85   :  { %5616 = vmatpush3.bf16.msra.mxu0 %v5613_v30  ;;  %v4532_v30 = vld [vmem:[%s6880_s3 + $0x158] sm:$0xff] }
 0xa88   :  { %5235 = vmatmul.mubr.msk.f32.vlgmr.msra.gmra.mrb[34].mxu0 %vm51_vm0, %v6430_v33 }
 0xb2b   :  { %v6579_v51 = vpop.f32.mrb[22].mxu0  ;;  %v6581_v32 = vpop.f32.mrb[30].mxu1 }
 0xb2c   :  { %v2208_v34 = vpop.f32.mrb[23].mxu0  ;;  %v6583_v35 = vpop.f32.mrb[31].mxu1 }
 0xb2d   :  { %v2451_v36 = vadd.f32 %v4465_v31, %v2208_v34  ;;  %v4531_v31 = vld [vmem:[%s6880_s3 + $0x150] sm:$0xff] }
 0xb2f   :  { %5253 = vmatprep.mubr.msk.f32.mxu1 %vm1098_vm1, %v2451_v36 }
 0xb33   :  { %v6592_v41 = vpop.f32.mrb[24].mxu0  ;;  %v5159_v43 = vpop.f32.mrb[32].mxu1 }
 0xb34   :  { %v2786_v49 = vadd.f32 %v5159_v43, %v4498_v37  ;;  %v6594_v50 = vpop.f32.mrb[25].mxu0  ;;  %v2542_v54 = vpop.f32.mrb[33].mxu1 }
 0xb35   :  { %v2785_v55 = vadd.f32 %v4497_v38, %v2542_v54  ;;  %v4535_v54 = vld [vmem:[%s6880_s3 + $0x170] sm:$0xff] }
 0xb37   :  { %v5617_v56 = vpack.c.bf16 %v2786_v49, %v2785_v55  ;;  %v4536_v49 = vld [vmem:[%s6880_s3 + $0x178] sm:$0xff] }
 0xb39   :  { %5619 = vmatprep.subr.msk.bf16.mxu1 %vm6128_vm2, %v5617_v56 }
 0xb3a   :  { %5622 = vmatpush3.bf16.xpose.msk.msra.mxu1 %vm6128_vm2, %v5617_v56  ;;  %v4466_v56 = vld [vmem:[%s6880_s3 + $0xc8] sm:$0xff] }
 0xb3b   :  { %v6603_v58 = vpop.f32.mrb[26].mxu0  ;;  %v2452_v62 = vadd.f32 %v6579_v51, %v4466_v56  ;;  %v4470_v51 = vld [vmem:[%s6880_s3 + $0xe8] sm:$0xff]  ;;  %v5795_v56 = vld [vmem:[%s6878_s1 + $0x30] sm:$0xff] }
 0xb3c   :  { %v5181_v59 = vpop.f32.mrb[34].mxu1  ;;  %v6608_v60 = vpop.f32.mrb[27].mxu0 }
 0xb3d   :  { %v2790_v40 = vadd.f32 %v5181_v59, %v4502_v57  ;;  %v2692_v47 = vpop.f32.mrb[35].mxu1  ;;  %v4467_v59 = vld [vmem:[%s6880_s3 + $0xd0] sm:$0xff] }
 0xb3e   :  { %v2789_v63 = vadd.f32 %v4501_v39, %v2692_v47 }
 0xb40   :  { %v5629_v0 = vpack.c.bf16 %v2790_v40, %v2789_v63  ;;  %v4468_v63 = vld [vmem:[%s6880_s3 + $0xd8] sm:$0xff] }
 0xb43   :  { %v5170_v48 = vpop.f32.mrb[28].mxu0 }
 0xb44   :  { %v2788_v5 = vadd.f32 %v5170_v48, %v4500_v45  ;;  %v5203_v46 = vpop.f32.mrb[36].mxu1  ;;  %v2617_v7 = vpop.f32.mrb[29].mxu0  ;;  %v4469_v45 = vld [vmem:[%s6880_s3 + $0xe0] sm:$0xff]  ;;  %v2456_v48 = vadd.f32 %v6581_v32, %v4470_v51  ;;  %v5788_v32 = vld [vmem:[%s6878_s1 + $0x8] sm:$0xff] }
 0xb45   :  { %v3120_v8 = vadd.f32 %v5203_v46, %v4530_v1  ;;  %v2787_v9 = vadd.f32 %v4499_v2, %v2617_v7  ;;  %v2876_v10 = vpop.f32.mrb[37].mxu1  ;;  %v2454_v1 = vadd.f32 %v6592_v41, %v4468_v63  ;;  %v2455_v2 = vadd.f32 %v4469_v45, %v6583_v35  ;;  %v4472_v41 = vld [vmem:[%s6880_s3 + $0xf8] sm:$0xff] }
 0xb46   :  { %v3119_v11 = vadd.f32 %v4529_v3, %v2876_v10  ;;  %v2458_v35 = vadd.f32 %v6603_v58, %v4472_v41 }
 0xb47   :  { %v5623_v12 = vpack.c.bf16 %v2788_v5, %v2787_v9 }
 0xb48   :  { %v5641_v13 = vpack.c.bf16 %v3120_v8, %v3119_v11 }
 0xb49   :  { %5625 = vmatprep.subr.msk.bf16.mxu1 %vm6128_vm2, %v5623_v12 }
 0xb4a   :  { %5642 = vmatprep.subr.bf16.mxu0 %v5641_v13  ;;  %5628 = vmatpush3.bf16.xpose.msk.msra.mxu1 %vm6128_vm2, %v5623_v12 }
 0xb4b   :  { %5644 = vmatpush3.bf16.msra.mxu0 %v5641_v13  ;;  %v5192_v17 = vpop.f32.mrb[30].mxu0  ;;  %5631 = vmatprep.subr.msk.bf16.mxu1 %vm6128_vm2, %v5629_v0 }
 0xb4c   :  { %v2792_v19 = vadd.f32 %v5192_v17, %v4504_v14  ;;  %v5225_v22 = vpop.f32.mrb[38].mxu1  ;;  %v2767_v23 = vpop.f32.mrb[31].mxu0 }
 0xb4d   :  { %v3124_v24 = vadd.f32 %v5225_v22, %v4534_v15  ;;  %v2791_v25 = vadd.f32 %v4503_v16, %v2767_v23  ;;  %v3026_v26 = vpop.f32.mrb[39].mxu1  ;;  %v5790_v16 = vld [vmem:[%s6878_s1 + $0x18] sm:$0xff] }
 0xb4e   :  { %v3123_v27 = vadd.f32 %v4533_v18, %v3026_v26 }
 0xb4f   :  { %v5635_v28 = vpack.c.bf16 %v2792_v19, %v2791_v25  ;;  %v5791_v19 = vld [vmem:[%s6878_s1 + $0x10] sm:$0xff] }
 0xb50   :  { %v5649_v29 = vpack.c.bf16 %v3124_v24, %v3123_v27 }
 0xb52   :  { %5634 = vmatpush3.bf16.xpose.msk.msra.mxu1 %vm6128_vm2, %v5629_v0  ;;  %v2453_v0 = vadd.f32 %v4467_v59, %v6594_v50  ;;  %v4471_v50 = vld [vmem:[%s6880_s3 + $0xf0] sm:$0xff] }
 0xb53   :  { %v5214_v34 = vpop.f32.mrb[32].mxu0  ;;  %5637 = vmatprep.subr.msk.bf16.mxu1 %vm6128_vm2, %v5635_v28  ;;  %v2457_v3 = vadd.f32 %v4471_v50, %v6608_v60  ;;  %v5789_v60 = vld [vmem:[%s6878_s1] sm:$0xff] }
 0xb54   :  { %v3122_v36 = vadd.f32 %v5214_v34, %v4532_v30  ;;  %v2951_v37 = vpop.f32.mrb[33].mxu0 }
 0xb55   :  { %v3121_v38 = vadd.f32 %v4531_v31, %v2951_v37  ;;  %v5793_v31 = vld [vmem:[%s6878_s1 + $0x20] sm:$0xff] }
 0xb57   :  { %v5645_v43 = vpack.c.bf16 %v3122_v36, %v3121_v38 }
 0xb59   :  { %5646 = vmatprep.subr.bf16.mxu0 %v5645_v43 }
 0xb5a   :  { %5640 = vmatpush3.bf16.xpose.msk.msra.mxu1 %vm6128_vm2, %v5635_v28  ;;  %5648 = vmatpush3.bf16.msra.mxu0 %v5645_v43  ;;  %v5792_v28 = vld [vmem:[%s6878_s1 + $0x28] sm:$0xff] }
 0xb5b   :  { %v5236_v55 = vpop.f32.mrb[34].mxu0  ;;  %5650 = vmatprep.subr.bf16.mxu0 %v5649_v29 }
 0xb5c   :  { %v3126_v57 = vadd.f32 %v5236_v55, %v4536_v49  ;;  %v3101_v39 = vpop.f32.mrb[35].mxu0 }
 0xb5d   :  { %v3125_v40 = vadd.f32 %v4535_v54, %v3101_v39  ;;  %v5794_v54 = vld [vmem:[%s6878_s1 + $0x38] sm:$0xff] }
 0xb5e   :  { %5652 = vmatpush3.bf16.msra.mxu0 %v5649_v29 }
 0xb5f   :  { %v5653_v47 = vpack.c.bf16 %v3126_v57, %v3125_v40 }
 0xb61   :  { %5254 = vmatmul.mubr.msk.f32.vlgmr.msra.gmra.mrb[40].mxu1 %vm1098_vm1, %v2452_v62  ;;  %5654 = vmatprep.subr.bf16.mxu0 %v5653_v47 }
 0xb62   :  { %5256 = vmatprep.mubr.msk.f32.mxu1 %vm1098_vm1, %v2453_v0  ;;  %5656 = vmatpush3.bf16.msra.mxu0 %v5653_v47 }
 0xb65   :  { %5257 = vmatmul.mubr.msk.f32.gmra.mrb[42].mxu1 %vm1098_vm1, %v2454_v1 }
 0xb66   :  { %5259 = vmatprep.mubr.msk.f32.mxu1 %vm1098_vm1, %v2455_v2 }
 0xb69   :  { %5260 = vmatmul.mubr.msk.f32.gmra.mrb[44].mxu1 %vm1098_vm1, %v2456_v48 }
 0xb6a   :  { %5262 = vmatprep.mubr.msk.f32.mxu1 %vm1098_vm1, %v2457_v3 }
 0xb6d   :  { %5263 = vmatmul.mubr.msk.f32.gmra.mrb[46].mxu1 %vm1098_vm1, %v2458_v35 }
 0xc34   :  { %v5255_v5 = vpop.f32.mrb[40].mxu1 }
 0xc35   :  { %v3281_v46 = vmul.f32 0.35355338, %v5255_v5  ;;  %v3241_v7 = vpop.f32.mrb[41].mxu1 }
 0xc36   :  { %v3280_v8 = vmul.f32 0.35355338, %v3241_v7 }
 0xc37   :  { %v3289_v9 = vadd.f32 %v5788_v32, %v3281_v46 }
 0xc38   :  { %v5258_v10 = vpop.f32.mrb[42].mxu1  ;;  %v3288_v11 = vadd.f32 %v5789_v60, %v3280_v8 }
 0xc39   :  { %v3283_v12 = vmul.f32 0.35355338, %v5258_v10  ;;  %v3251_v13 = vpop.f32.mrb[43].mxu1  ;;  %v3299_v58 = vsel %vm1268_vm3, %v3289_v9, -inf }
 0xc3a   :  { %v3282_v14 = vmul.f32 0.35355338, %v3251_v13  ;;  %3300 = vmax.xlane.f32.xlu1 %v3299_v58  ;;  %v3296_v15 = vsel %vm1268_vm3, %v3288_v11, -inf }
 0xc3b   :  { %3297 = vmax.xlane.f32.xlu0 %v3296_v15  ;;  %v3291_v17 = vadd.f32 %v5790_v16, %v3283_v12 }
 0xc3c   :  { %v5261_v18 = vpop.f32.mrb[44].mxu1  ;;  %v3290_v22 = vadd.f32 %v5791_v19, %v3282_v14 }
 0xc3d   :  { %v3285_v23 = vmul.f32 0.35355338, %v5261_v18  ;;  %v3261_v24 = vpop.f32.mrb[45].mxu1  ;;  %v3305_v25 = vsel %vm1268_vm3, %v3291_v17, -inf }
 0xc3e   :  { %v3284_v26 = vmul.f32 0.35355338, %v3261_v24  ;;  %3306 = vmax.xlane.f32.xlu1 %v3305_v25  ;;  %v3302_v27 = vsel %vm1268_vm3, %v3290_v22, -inf }
 0xc3f   :  { %3303 = vmax.xlane.f32.xlu0 %v3302_v27  ;;  %v3293_v29 = vadd.f32 %v5792_v28, %v3285_v23 }
 0xc40   :  { %v5264_v30 = vpop.f32.mrb[46].mxu1  ;;  %v3292_v34 = vadd.f32 %v5793_v31, %v3284_v26 }
 0xc41   :  { %v3287_v36 = vmul.f32 0.35355338, %v5264_v30  ;;  %v3271_v37 = vpop.f32.mrb[47].mxu1  ;;  %v3311_v38 = vsel %vm1268_vm3, %v3293_v29, -inf  ;;  %v4561_v30 = vld [vmem:[%s6881_s4 + $0x20] sm:$0xff] }
 0xc42   :  { %v3286_v43 = vmul.f32 0.35355338, %v3271_v37  ;;  %3312 = vmax.xlane.f32.xlu1 %v3311_v38  ;;  %v3308_v49 = vsel %vm1268_vm3, %v3292_v34, -inf  ;;  %5293 = vmatprep.subr.mxu0 %v4561_v30 }
 0xc43   :  { %3309 = vmax.xlane.f32.xlu0 %v3308_v49  ;;  %v3295_v55 = vadd.f32 %v5794_v54, %v3287_v36 }
 0xc44   :  { %v3294_v57 = vadd.f32 %v5795_v56, %v3286_v43 }
 0xc45   :  { %v3317_v39 = vsel %vm1268_vm3, %v3295_v55, -inf }
 0xc46   :  { %3318 = vmax.xlane.f32.xlu1 %v3317_v39  ;;  %v3314_v59 = vsel %vm1268_vm3, %v3294_v57, -inf }
 0xc47   :  { %3315 = vmax.xlane.f32.xlu0 %v3314_v59 }
 0xcc7   :  { %v3301_v40 = vpop.xlane.xlu1 %3300 }
 0xcc8   :  { %v3321_v62 = vsub.f32 %v3289_v9, %v3301_v40  ;;  %v3298_v47 = vpop.xlane.xlu0 %3297 }
 0xcc9   :  { %v3320_v63 = vsub.f32 %v3288_v11, %v3298_v47 }
 0xcca   :  { %v3330_v0 = vmul.f32 1.442695, %v3321_v62 }
 0xccb   :  { %v3328_v45 = vmul.f32 1.442695, %v3320_v63  ;;  %v3307_v1 = vpop.xlane.xlu1 %3306 }
 0xccc   :  { %5742 = vpow2.f32 %v3330_v0  ;;  %v3323_v51 = vsub.f32 %v3291_v17, %v3307_v1  ;;  %v3304_v2 = vpop.xlane.xlu0 %3303 }
 0xccd   :  { %5744 = vpow2.f32 %v3328_v45  ;;  %v3322_v50 = vsub.f32 %v3290_v22, %v3304_v2 }
 0xcce   :  { %v3334_v48 = vmul.f32 1.442695, %v3323_v51 }
 0xccf   :  { %v3332_v41 = vmul.f32 1.442695, %v3322_v50  ;;  %v3313_v3 = vpop.xlane.xlu1 %3312 }
 0xcd0   :  { %5746 = vpow2.f32 %v3334_v48  ;;  %v3325_v35 = vsub.f32 %v3293_v29, %v3313_v3  ;;  %v3310_v5 = vpop.xlane.xlu0 %3309 }
 0xcd1   :  { %5748 = vpow2.f32 %v3332_v41  ;;  %v3324_v46 = vsub.f32 %v3292_v34, %v3310_v5  ;;  %v4562_v41 = vld [vmem:[%s6881_s4 + $0x28] sm:$0xff]  ;;  %v4563_v5 = vld [vmem:[%s6881_s4 + $0x30] sm:$0xff] }
 0xcd2   :  { %v3338_v7 = vmul.f32 1.442695, %v3325_v35 }
 0xcd3   :  { %v3336_v8 = vmul.f32 1.442695, %v3324_v46  ;;  %v3319_v32 = vpop.xlane.xlu1 %3318 }
 0xcd4   :  { %5750 = vpow2.f32 %v3338_v7  ;;  %v3327_v9 = vsub.f32 %v3295_v55, %v3319_v32  ;;  %v3316_v10 = vpop.xlane.xlu0 %3315 }
 0xcd5   :  { %5752 = vpow2.f32 %v3336_v8  ;;  %v3326_v60 = vsub.f32 %v3294_v57, %v3316_v10  ;;  %v4564_v8 = vld [vmem:[%s6881_s4 + $0x38] sm:$0xff] }
 0xcd6   :  { %v5743_v11 = vpop.eup %5742  ;;  %v3342_v12 = vmul.f32 1.442695, %v3327_v9 }
 0xcd7   :  { %v5745_v13 = vpop.eup %5744  ;;  %v3340_v58 = vmul.f32 1.442695, %v3326_v60  ;;  %v3347_v14 = vsel %vm1268_vm3, %v5743_v11, 0.0 }
 0xcd8   :  { %5754 = vpow2.f32 %v3342_v12  ;;  %3348 = vadd.xlane.f32.xlu1 %v3347_v14  ;;  %v3344_v15 = vsel %vm1268_vm3, %v5745_v13, 0.0 }
 0xcd9   :  { %5756 = vpow2.f32 %v3340_v58  ;;  %3345 = vadd.xlane.f32.xlu0 %v3344_v15 }
 0xcda   :  { %v5747_v16 = vpop.eup %5746 }
 0xcdb   :  { %v5749_v17 = vpop.eup %5748  ;;  %v3353_v18 = vsel %vm1268_vm3, %v5747_v16, 0.0 }
 0xcdc   :  { %3354 = vadd.xlane.f32.xlu1 %v3353_v18  ;;  %v3350_v19 = vsel %vm1268_vm3, %v5749_v17, 0.0 }
 0xcdd   :  { %3351 = vadd.xlane.f32.xlu0 %v3350_v19 }
 0xcde   :  { %v5751_v22 = vpop.eup %5750 }
 0xcdf   :  { %v5753_v23 = vpop.eup %5752  ;;  %v3359_v24 = vsel %vm1268_vm3, %v5751_v22, 0.0 }
 0xce0   :  { %3360 = vadd.xlane.f32.xlu1 %v3359_v24  ;;  %v3356_v25 = vsel %vm1268_vm3, %v5753_v23, 0.0 }
 0xce1   :  { %3357 = vadd.xlane.f32.xlu0 %v3356_v25  ;;  %v6769_v25 = vld [vmem:[%s6885_s8 + $0x8] sm:$0x3f] }
 0xce2   :  { %v5755_v26 = vpop.eup %5754 }
 0xce3   :  { %v5757_v27 = vpop.eup %5756  ;;  %v3365_v28 = vsel %vm1268_vm3, %v5755_v26, 0.0 }
 0xce4   :  { %3366 = vadd.xlane.f32.xlu1 %v3365_v28  ;;  %v3362_v29 = vsel %vm1268_vm3, %v5757_v27, 0.0 }
 0xce5   :  { %3363 = vadd.xlane.f32.xlu0 %v3362_v29 }
 0xd65   :  { %v3349_v31 = vpop.xlane.xlu1 %3348 }
 0xd66   :  { %5758 = vrcp.f32 %v3349_v31  ;;  %v3346_v34 = vpop.xlane.xlu0 %3345 }
 0xd67   :  { %5760 = vrcp.f32 %v3346_v34 }
 0xd69   :  { %v3355_v36 = vpop.xlane.xlu1 %3354 }
 0xd6a   :  { %5762 = vrcp.f32 %v3355_v36  ;;  %v3352_v37 = vpop.xlane.xlu0 %3351 }
 0xd6b   :  { %5764 = vrcp.f32 %v3352_v37 }
 0xd6d   :  { %v3361_v38 = vpop.xlane.xlu1 %3360 }
 0xd6e   :  { %5766 = vrcp.f32 %v3361_v38  ;;  %v3358_v43 = vpop.xlane.xlu0 %3357 }
 0xd6f   :  { %5768 = vrcp.f32 %v3358_v43 }
 0xd70   :  { %v5759_v49 = vpop.eup %5758 }
 0xd71   :  { %v5761_v54 = vpop.eup %5760  ;;  %v3367_v55 = vpop.xlane.xlu1 %3366  ;;  %v3377_v39 = vmul.f32 %v5759_v49, %v5743_v11 }
 0xd72   :  { %5770 = vrcp.f32 %v3367_v55  ;;  %v3364_v56 = vpop.xlane.xlu0 %3363  ;;  %v3376_v57 = vmul.f32 %v5761_v54, %v5745_v13 }
 0xd73   :  { %5772 = vrcp.f32 %v3364_v56 }
 0xd74   :  { %v5763_v59 = vpop.eup %5762  ;;  %5281 = vmatprep.mubr.msk.f32.mxu0 %vm1268_vm3, %v3376_v57 }
 0xd75   :  { %v5765_v40 = vpop.eup %5764  ;;  %5282 = vmatmul.mubr.msk.f32.vlgmr.msra.gmra.mrb[36].mxu0 %vm1268_vm3, %v3377_v39  ;;  %v3379_v47 = vmul.f32 %v5763_v59, %v5747_v16 }
 0xd76   :  { %v3378_v62 = vmul.f32 %v5765_v40, %v5749_v17  ;;  %5294 = vmatpush3.msra.mxu0 %v4561_v30  ;;  %v3859_v30 = vrot.slane %v6769_v25, %v1830_v4 }
 0xd77   :  { %5298 = vmatprep.subr.mxu0 %v4562_v41 }
 0xd78   :  { %v5767_v63 = vpop.eup %5766  ;;  %5284 = vmatprep.mubr.msk.f32.mxu0 %vm1268_vm3, %v3378_v62 }
 0xd79   :  { %v5769_v0 = vpop.eup %5768  ;;  %5285 = vmatmul.mubr.msk.f32.gmra.mrb[38].mxu0 %vm1268_vm3, %v3379_v47  ;;  %v3381_v1 = vmul.f32 %v5767_v63, %v5751_v22 }
 0xd7a   :  { %v3380_v45 = vmul.f32 %v5769_v0, %v5753_v23 }
 0xd7c   :  { %v5771_v51 = vpop.eup %5770  ;;  %5287 = vmatprep.mubr.msk.f32.mxu0 %vm1268_vm3, %v3380_v45 }
 0xd7d   :  { %v5773_v2 = vpop.eup %5772  ;;  %5288 = vmatmul.mubr.msk.f32.gmra.mrb[40].mxu0 %vm1268_vm3, %v3381_v1  ;;  %v3383_v48 = vmul.f32 %v5771_v51, %v5755_v26  ;;  %v4574_v1 = vld [vmem:[%s6882_s5 + $0x28] sm:$0xff] }
 0xd7e   :  { %v3382_v50 = vmul.f32 %v5773_v2, %v5757_v27  ;;  %v4575_v2 = vld [vmem:[%s6882_s5 + $0x30] sm:$0xff] }
 0xd80   :  { %5290 = vmatprep.mubr.msk.f32.mxu0 %vm1268_vm3, %v3382_v50  ;;  %v4576_v50 = vld [vmem:[%s6882_s5 + $0x38] sm:$0xff] }
 0xd81   :  { %5291 = vmatmul.mubr.msk.f32.gmra.mrb[42].mxu0 %vm1268_vm3, %v3383_v48  ;;  %v5661_v48 = vpack.c.bf16 %v4576_v50, %v4575_v2 }
 0xe48   :  { %v5283_v3 = vpop.f32.mrb[36].mxu0 }
 0xe49   :  { %v3474_v35 = vpop.f32.mrb[37].mxu0 }
 0xe4a   :  { %5295 = vmatprep.mubr.msk.f32.mxu0 %vm1098_vm1, %v3474_v35 }
 0xe4b   :  { %5296 = vmatmul.mubr.msk.f32.vlgmr.msra.gmra.mrb[44].mxu0 %vm1098_vm1, %v5283_v3 }
 0xe4c   :  { %v5286_v46 = vpop.f32.mrb[38].mxu0  ;;  %5299 = vmatpush3.msra.mxu0 %v4562_v41 }
 0xe4d   :  { %v3484_v7 = vpop.f32.mrb[39].mxu0  ;;  %5303 = vmatprep.subr.mxu0 %v4563_v5 }
 0xe4e   :  { %5300 = vmatprep.mubr.msk.f32.mxu0 %vm1098_vm1, %v3484_v7 }
 0xe4f   :  { %5301 = vmatmul.mubr.msk.f32.vlgmr.msra.gmra.mrb[46].mxu0 %vm1098_vm1, %v5286_v46 }
 0xe50   :  { %v5289_v32 = vpop.f32.mrb[40].mxu0  ;;  %5304 = vmatpush3.msra.mxu0 %v4563_v5 }
 0xe51   :  { %v3494_v9 = vpop.f32.mrb[41].mxu0  ;;  %5308 = vmatprep.subr.mxu0 %v4564_v8 }
 0xe52   :  { %5305 = vmatprep.mubr.msk.f32.mxu0 %vm1098_vm1, %v3494_v9 }
 0xe53   :  { %5306 = vmatmul.mubr.msk.f32.vlgmr.msra.gmra.mrb[48].mxu0 %vm1098_vm1, %v5289_v32 }
 0xe54   :  { %v5292_v10 = vpop.f32.mrb[42].mxu0  ;;  %5309 = vmatpush3.msra.mxu0 %v4564_v8  ;;  %v3893_v8 = vrot.slane %v6769_v25, %v1864_v52  ;;  %v4581_v52 = vld [vmem:[%s6884_s7 + $0x40] sm:$0xff] }
 0xe55   :  { %v3504_v60 = vpop.f32.mrb[43].mxu0 }
 0xe56   :  { %5310 = vmatprep.mubr.msk.f32.mxu0 %vm1098_vm1, %v3504_v60 }
 0xe57   :  { %5311 = vmatmul.mubr.msk.f32.vlgmr.msra.gmra.mrb[50].mxu0 %vm1098_vm1, %v5292_v10 }
 0xf1e   :  { %v5297_v11 = vpop.f32.mrb[44].mxu0 }
 0xf1f   :  { %v3590_v12 = vpop.f32.mrb[45].mxu0  ;;  %v3849_v58 = vsel %vm51_vm0, %v5297_v11, 0.0  ;;  %v3899_v11 = vrot.slane %v6769_v25, %v1870_v53  ;;  %v4583_v53 = vld [vmem:[%s6884_s7 + $0x50] sm:$0xff] }
 0xf20   :  { %v3842_v16 = vsel %vm51_vm0, %v3590_v12, 0.0 }
 0xf22   :  { %v5302_v13 = vpop.f32.mrb[46].mxu0 }
 0xf23   :  { %v3850_v14 = vsel %vm51_vm0, %v5302_v13, 0.0  ;;  %v3671_v15 = vpop.f32.mrb[47].mxu0 }
 0xf24   :  { %v3851_v17 = vadd.f32 %v3850_v14, %v3849_v58  ;;  %v3843_v18 = vsel %vm51_vm0, %v3671_v15, 0.0  ;;  %v4582_v15 = vld [vmem:[%s6884_s7 + $0x48] sm:$0xff] }
 0xf25   :  { %v3844_v19 = vadd.f32 %v3843_v18, %v3842_v16  ;;  %v5665_v16 = vpack.c.bf16 %v4582_v15, %v4581_v52 }
 0xf26   :  { %v5307_v22 = vpop.f32.mrb[48].mxu0 }
 0xf27   :  { %v3852_v23 = vsel %vm51_vm0, %v5307_v22, 0.0  ;;  %v3752_v24 = vpop.f32.mrb[49].mxu0  ;;  %v4586_v22 = vld [vmem:[%s6884_s7 + $0x68] sm:$0xff]  ;;  %5666 = vmatprep.subr.bf16.mxu0 %v5665_v16 }
 0xf28   :  { %v3853_v26 = vadd.f32 %v3852_v23, %v3851_v17  ;;  %v3845_v27 = vsel %vm51_vm0, %v3752_v24, 0.0  ;;  %v4584_v17 = vld [vmem:[%s6884_s7 + $0x58] sm:$0xff]  ;;  %5668 = vmatpush3.bf16.msra.mxu0 %v5665_v16  ;;  %v4587_v24 = vld [vmem:[%s6884_s7 + $0x70] sm:$0xff]  ;;  %v4139_v16 = vrot.slane %v6769_v25, %v2107_v20  ;;  %v4230_v20 = vld [vmem:[%s6887_s10] sm:$0xff] }
 0xf29   :  { %v3846_v28 = vadd.f32 %v3845_v27, %v3844_v19  ;;  %v5669_v18 = vpack.c.bf16 %v4584_v17, %v4583_v53  ;;  %v4585_v19 = vld [vmem:[%s6884_s7 + $0x60] sm:$0xff] }
 0xf2a   :  { %v5312_v29 = vpop.f32.mrb[50].mxu0  ;;  %v5673_v23 = vpack.c.bf16 %v4586_v22, %v4585_v19  ;;  %v4145_v22 = vrot.slane %v6769_v25, %v2113_v21 }
 0xf2b   :  { %v3854_v31 = vsel %vm51_vm0, %v5312_v29, 0.0  ;;  %v3833_v34 = vpop.f32.mrb[51].mxu0  ;;  %5670 = vmatprep.subr.bf16.mxu0 %v5669_v18 }
 0xf2c   :  { %v3855_v36 = vadd.f32 %v3854_v31, %v3853_v26  ;;  %v3847_v37 = vsel %vm51_vm0, %v3833_v34, 0.0  ;;  %v4588_v26 = vld [vmem:[%s6884_s7 + $0x78] sm:$0xff]  ;;  %5672 = vmatpush3.bf16.msra.mxu0 %v5669_v18 }
 0xf2d   :  { %v3848_v38 = vadd.f32 %v3847_v37, %v3846_v28  ;;  %5674 = vmatprep.subr.bf16.mxu0 %v5673_v23  ;;  %v5677_v27 = vpack.c.bf16 %v4588_v26, %v4587_v24  ;;  %v4578_v28 = vld [vmem:[%s6883_s6 + $0x1] ss:$0 sm:$0xff]  ;;  %v4151_v26 = vand.u32 127, %v1828_v42  ;;  %v4232_v42 = vld [vmem:[%s6887_s10 + $0x10] sm:$0xff] }
 0xf2e   :  { %v3861_v43 = vadd.f32 %v3859_v30, %v3855_v36 }
 0xf2f   :  { %v3860_v49 = vadd.f32 %v3859_v30, %v3848_v38 }
 0xf30   :  { %v3863_v54 = vadd.f32 %v3861_v43, %v6430_v33  ;;  %5676 = vmatpush3.bf16.msra.mxu0 %v5673_v23 }
 0xf31   :  { %v3862_v55 = vadd.f32 %v3860_v49, %v6428_v6  ;;  %v4573_v6 = vld [vmem:[%s6882_s5 + $0x20] sm:$0xff]  ;;  %5678 = vmatprep.subr.bf16.mxu0 %v5677_v27 }
 0xf32   :  { %v3867_v56 = vsel %vm51_vm0, %v3863_v54, 0.0  ;;  %v5657_v51 = vpack.c.bf16 %v4574_v1, %v4573_v6 }
 0xf33   :  { %3868 = vadd.xlane.f32.xlu1 %v3867_v56  ;;  %v3864_v57 = vsel %vm51_vm0, %v3862_v55, 0.0 }
 0xf34   :  { %3865 = vadd.xlane.f32.xlu0 %v3864_v57  ;;  %5658 = vmatprep.subr.bf16.mxu1 %v5657_v51 }
 0xf35   :  { %5660 = vmatpush3.bf16.msra.mxu1 %v5657_v51  ;;  %5680 = vmatpush3.bf16.msra.mxu0 %v5677_v27  ;;  %v4152_v27 = vmul.u32 8, %v6288_v61  ;;  %v4233_v61 = vld [vmem:[%s6887_s10 + $0x18] sm:$0xff] }
 0xf36   :  { %5662 = vmatprep.subr.bf16.mxu1 %v5661_v48 }
 0xf37   :  { %vm4153_vm5 = vcmp.eq.s32.totalorder %v4151_v26, %v4152_v27 }
 0xf39   :  { %5664 = vmatpush3.bf16.msra.mxu1 %v5661_v48 }
 0xfc0   :  { %v3869_v4 = vpop.xlane.xlu1 %3868 }
 0xfc1   :  { %v3871_v39 = vmul.f32 0.03125, %v3869_v4  ;;  %v3866_v59 = vpop.xlane.xlu0 %3865 }
 0xfc2   :  { %v3870_v40 = vmul.f32 0.03125, %v3866_v59 }
 0xfc3   :  { %v3873_v62 = vsub.f32 %v3863_v54, %v3871_v39 }
 0xfc4   :  { %v3872_v47 = vsub.f32 %v3862_v55, %v3870_v40 }
 0xfc5   :  { %v3875_v63 = vmul.f32 %v3873_v62, %v3873_v62 }
 0xfc6   :  { %v3874_v0 = vmul.f32 %v3872_v47, %v3872_v47 }
 0xfc7   :  { %v3879_v45 = vsel %vm51_vm0, %v3875_v63, 0.0 }
 0xfc8   :  { %3880 = vadd.xlane.f32.xlu1 %v3879_v45  ;;  %v3876_v33 = vsel %vm51_vm0, %v3874_v0, 0.0 }
 0xfc9   :  { %3877 = vadd.xlane.f32.xlu0 %v3876_v33  ;;  %v4026_v33 = vrot.slane %v6769_v25, %v1994_v44 }
0x1055   :  { %v3881_v41 = vpop.xlane.xlu1 %3880 }
0x1056   :  { %v3883_v3 = vmul.f32 0.03125, %v3881_v41  ;;  %v3878_v35 = vpop.xlane.xlu0 %3877 }
0x1057   :  { %v3882_v5 = vmul.f32 0.03125, %v3878_v35 }
0x1058   :  { %v3885_v46 = vadd.f32 1e-12, %v3883_v3 }
0x1059   :  { %v3884_v7 = vadd.f32 1e-12, %v3882_v5 }
0x105a   :  { %5774 = vrsqrt.f32 %v3885_v46 }
0x105b   :  { %5776 = vrsqrt.f32 %v3884_v7 }
0x1064   :  { %v5775_v32 = vpop.eup %5774 }
0x1065   :  { %v5777_v9 = vpop.eup %5776  ;;  %v3889_v10 = vmul.f32 %v5775_v32, %v3873_v62 }
0x1066   :  { %v3888_v60 = vmul.f32 %v5777_v9, %v3872_v47 }
0x1067   :  { %v3895_v12 = vmul.f32 %v3893_v8, %v3889_v10 }
0x1068   :  { %v3894_v13 = vmul.f32 %v3893_v8, %v3888_v60 }
0x1069   :  { %v3901_v14 = vadd.f32 %v3899_v11, %v3895_v12  ;;  %v5822_v12 = vmov 0.0  }
0x106a   :  { %v3900_v58 = vadd.f32 %v3899_v11, %v3894_v13  ;;  %v5820_v11 = vmov 0.0|0.0   ;;  %v4591_v21 = vsel %vm4153_vm5, 1.0, %v5822_v12 }
0x106b   :  { %5681 = vmatprep.subr.bf16.mxu1 %v5820_v11 }
0x106c   :  { %5321 = vmatprep.mubr.msk.f32.mxu1 %vm51_vm0, %v3900_v58 }
0x106d   :  { %5322 = vmatmul.mubr.msk.f32.vlgmr.msra.gmra.mrb[48].mxu1 %vm51_vm0, %v3901_v14 }
0x106e   :  { %5347 = vmatprep.mubr.msk.f32.mxu1 %vm5821_vm4, %v5822_v12 }
0x1140   :  { %v5323_v29 = vpop.f32.mrb[48].mxu1 }
0x1141   :  { %v3993_v30 = vadd.f32 %v5323_v29, %v4578_v28  ;;  %v3987_v31 = vpop.f32.mrb[49].mxu1 }
0x1142   :  { %v3988_v34 = vadd.f32 %v4578_v28, %v3987_v31  ;;  %v4231_v31 = vld [vmem:[%s6887_s10 + $0x8] sm:$0xff]  ;;  %s5823_s10 = smov [#allocation2]  }
0x1143   :  { %v3999_v36 = vmul.f32 0.044715, %v3993_v30  ;;  %v3997_v63 = vmul.f32 0.5, %v3993_v30  ;;  %v5685_v25 = vpack.c.bf16 %v4231_v31, %v4230_v20  ;;  %s4321_s5 = sshll.u32 %s5823_s10, 4  ;;  %s4322_s5 = int_to_ptr.vmem [resolvable:$true] %s4321_s5 }
0x1144   :  { %v3998_v37 = vmul.f32 0.044715, %v3988_v34  ;;  %v3996_v62 = vmul.f32 0.5, %v3988_v34  ;;  %s5796_s29 = scalar_lea.vmem %s4322_s5, 32  ;;  %p5801_p1 = scmp.lt.s32.totalorder %s4322_s5, %s4322_s5 }
0x1145   :  { %v4001_v38 = vmul.f32 %v3999_v36, %v3993_v30  ;;  %v5688_v36 = vpack.c.bf16 %v4233_v61, %v4232_v42  ;;  %p5797_p0 = scmp.ne.s32.totalorder %s4322_s5, %s5796_s29  ;;  %p5802_p2 = scmp.lt.s32.totalorder %s5796_s29, %s5796_s29 }
0x1146   :  { %v4000_v43 = vmul.f32 %v3998_v37, %v3988_v34 }
0x1147   :  { %v4003_v49 = vmul.f32 %v4001_v38, %v3993_v30  ;;  %p5803_p3 = por %p5802_p2, %p5801_p1 }
0x1148   :  { %v4002_v54 = vmul.f32 %v4000_v43, %v3988_v34  ;;  %v4593_v43 = vld [vmem:[%s6886_s9 + $0x2] ss:$0 sm:$0xff] }
0x1149   :  { %v4005_v55 = vadd.f32 %v4003_v49, %v3993_v30  ;;  %p5804_p4 = pnand %p5803_p3, %p5797_p0 }
0x114a   :  { %v4004_v56 = vadd.f32 %v4002_v54, %v3988_v34 }
0x114b   :  { %v4007_v57 = vmul.f32 0.7978846, %v4005_v55 }
0x114c   :  { %v4006_v4 = vmul.f32 0.7978846, %v4004_v56 }
0x114d   :  { %5778 = vtanh.f32 %v4007_v57 }
0x114e   :  { %5780 = vtanh.f32 %v4006_v4 }
0x1157   :  { %v5779_v39 = vpop.eup %5778 }
0x1158   :  { %v5781_v59 = vpop.eup %5780  ;;  %v4011_v40 = vadd.f32 1.0, %v5779_v39 }
0x1159   :  { %v4010_v47 = vadd.f32 1.0, %v5781_v59 }
0x115a   :  { %v4013_v45 = vmul.f32 %v4011_v40, %v3997_v63 }
0x115b   :  { %v4012_v0 = vmul.f32 %v4010_v47, %v3996_v62 }
0x115d   :  { %5340 = vmatprep.mubr.msk.f32.mxu0 %vm1268_vm3, %v4012_v0 }
0x115e   :  { %5341 = vmatmul.mubr.msk.f32.vlgmr.msra.gmra.mrb[52].mxu0 %vm1268_vm3, %v4013_v45 }
0x1231   :  { %v5342_v6 = vpop.f32.mrb[52].mxu0 }
0x1232   :  { %v4105_v1 = vadd.f32 %v5342_v6, %v4026_v33  ;;  %v4099_v51 = vpop.f32.mrb[53].mxu0 }
0x1233   :  { %v4100_v2 = vadd.f32 %v4099_v51, %v4026_v33 }
0x1234   :  { %v4109_v50 = vadd.f32 %v4105_v1, %v3901_v14 }
0x1235   :  { %v4108_v48 = vadd.f32 %v4100_v2, %v3900_v58 }
0x1236   :  { %v4113_v41 = vsel %vm51_vm0, %v4109_v50, 0.0 }
0x1237   :  { %4114 = vadd.xlane.f32.xlu1 %v4113_v41  ;;  %v4110_v3 = vsel %vm51_vm0, %v4108_v48, 0.0 }
0x1238   :  { %4111 = vadd.xlane.f32.xlu0 %v4110_v3 }
0x12c4   :  { %v4115_v35 = vpop.xlane.xlu1 %4114 }
0x12c5   :  { %v4117_v5 = vmul.f32 0.03125, %v4115_v35  ;;  %v4112_v46 = vpop.xlane.xlu0 %4111 }
0x12c6   :  { %v4116_v7 = vmul.f32 0.03125, %v4112_v46 }
0x12c7   :  { %v4119_v8 = vsub.f32 %v4109_v50, %v4117_v5 }
0x12c8   :  { %v4118_v32 = vsub.f32 %v4108_v48, %v4116_v7 }
0x12c9   :  { %v4121_v9 = vmul.f32 %v4119_v8, %v4119_v8 }
0x12ca   :  { %v4120_v44 = vmul.f32 %v4118_v32, %v4118_v32 }
0x12cb   :  { %v4125_v10 = vsel %vm51_vm0, %v4121_v9, 0.0 }
0x12cc   :  { %4126 = vadd.xlane.f32.xlu1 %v4125_v10  ;;  %v4122_v60 = vsel %vm51_vm0, %v4120_v44, 0.0 }
0x12cd   :  { %4123 = vadd.xlane.f32.xlu0 %v4122_v60 }
0x1359   :  { %v4127_v13 = vpop.xlane.xlu1 %4126 }
0x135a   :  { %v4129_v58 = vmul.f32 0.03125, %v4127_v13  ;;  %v4124_v14 = vpop.xlane.xlu0 %4123 }
0x135b   :  { %v4128_v52 = vmul.f32 0.03125, %v4124_v14 }
0x135c   :  { %v4131_v15 = vadd.f32 1e-12, %v4129_v58 }
0x135d   :  { %v4130_v53 = vadd.f32 1e-12, %v4128_v52 }
0x135e   :  { %5782 = vrsqrt.f32 %v4131_v15 }
0x135f   :  { %5784 = vrsqrt.f32 %v4130_v53 }
0x1368   :  { %v5783_v17 = vpop.eup %5782 }
0x1369   :  { %v5785_v18 = vpop.eup %5784  ;;  %v4135_v19 = vmul.f32 %v5783_v17, %v4119_v8 }
0x136a   :  { %v4134_v23 = vmul.f32 %v5785_v18, %v4118_v32 }
0x136b   :  { %v4141_v24 = vmul.f32 %v4139_v16, %v4135_v19 }
0x136c   :  { %v4140_v28 = vmul.f32 %v4139_v16, %v4134_v23 }
0x136d   :  { %v4147_v29 = vadd.f32 %v4145_v22, %v4141_v24 }
0x136e   :  { %v4146_v30 = vadd.f32 %v4145_v22, %v4140_v28 }
0x1370   :  { %v5682_v34 = vpack.c.bf16 %v4147_v29, %v4146_v30 }
0x1372   :  { %5683 = vmatpush3.bf16.msra.mxu1 %v5682_v34 }
0x1373   :  { %5684 = vmatprep.subr.bf16.mxu1 %v5820_v11 }
0x1375   :  { %5348 = vmatmul.mubr.msk.f32.vlgmr.msra.gmra.mrb[50].mxu1 %vm4156_vm6, %v4591_v21 }
0x1376   :  { %5686 = vmatpush3.bf16.msra.mxu1 %v5685_v25  ;;  %5358 = vmatprep.mubr.msk.f32.mxu1 %vm5821_vm4, %v5822_v12 }
0x1377   :  { %5687 = vmatprep.subr.bf16.mxu1 %v5820_v11 }
0x137a   :  { %5689 = vmatpush3.bf16.msra.mxu1 %v5688_v36 }
0x1448   :  { %v4226_v37 = vpop.f32.mrb[50].mxu1 }
0x1449   :  { %v5349_v38 = vpop.f32.mrb[51].mxu1  ;;  %5359 = vmatmul.mubr.msk.f32.vlgmr.msra.gmra.mrb[52].mxu1 %vm51_vm0, %v4226_v37 }
0x151c   :  { %v4308_v49 = vpop.f32.mrb[52].mxu1 }
0x151d   :  { %v4309_v54 = vadd.f32 %v4593_v43, %v4308_v49  ;;  %v5360_v55 = vpop.f32.mrb[53].mxu1 }
0x151f   :  { %5786 = vtanh.f32 %v4309_v54 }
0x1529   :  { %v5787_v56 = vpop.eup %5786 }
0x152a   :  { %4314 = vst.msk [vmem:[#allocation2] sm:$0x3] %vm4313_vm7, %v5787_v56 }
0x152b   :  { %5807 = shalt.err (!%p5804_p4)
}
0x152c   :  { %s5808_s9 = scalar_lea.hbm %s6888_s11, 32 }
0x152d   :  { %p5809_p5 = scmp.ne.s32.totalorder %s6888_s11, %s5808_s9  ;;  %p5812_p6 = scmp.lt.u32.totalorder %s5808_s9, %s6888_s11 }
0x152f   :  { %p5814_p7 = pnand %p5812_p6, %p5809_p5 }
0x1531   :  { %5817 = shalt.err (!%p5814_p7)
}
0x1532   :  { %4324 = dma.vmem_to_hbm [thread:$0]  %s4322_s5, 32, %s6888_s11, [#allocation3]  }
0x1533   :  { %5818 = dma.done.wait [#allocation3], 32  }
0x1534   :  { %5819 = vsyncadd [#allocation3], 4294967264 }
0x1535   :  { %4328 = vsyncpa [#allocation3], 1 }

</bundles_post_ra>
